<compile_context>
chip_gen: v7x
topology: tpu7x:2x2x1
jax: 0.10.0
libtpu: 0.0.40
codegen_flags: <defaults>
</compile_context>

<pallas_src>
import jax
import jax.numpy as jnp
from jax.experimental import pallas as pl
from jax.experimental.pallas import tpu as pltpu

_EPS = 1e-16


# ----------------------------------------------------------------------------
# Fused per-step math (traced inside the Pallas kernel)
# ----------------------------------------------------------------------------
def _addressing_fused(proj, prev_w, mem_e, mem_norm, shift_mat):
    """Graves-2014 addressing using a precomputed [P_prev|P_next] shift matrix.

    proj packs [k (M) | beta (1) | g (1) | s (3) | gamma (1)].
    mem_e / mem_norm are shared between the read and write heads.
    """
    N, M = mem_e.shape[1], mem_e.shape[2]
    k = proj[:, :M]
    beta = jax.nn.softplus(proj[:, M:M + 1])
    g = jax.nn.sigmoid(proj[:, M + 1:M + 2])
    s = jax.nn.softmax(proj[:, M + 2:M + 5], axis=-1)
    gamma = 1.0 + jax.nn.softplus(proj[:, M + 5:M + 6])

    k_e = k + _EPS
    dots = jnp.sum(mem_e * k_e[:, None, :], axis=-1)                       # (B, N)
    k_norm = jnp.maximum(jnp.sqrt(jnp.sum(k_e * k_e, axis=-1, keepdims=True)), 1e-8)
    cos = dots / (mem_norm * k_norm)
    w_c = jax.nn.softmax(beta * cos, axis=-1)                              # content
    w_g = g * w_c + (1.0 - g) * prev_w                                     # interpolate
    sh = jnp.dot(w_g, shift_mat, preferred_element_type=jnp.float32)       # (B, 2N)
    w_t = s[:, 0:1] * sh[:, :N] + s[:, 1:2] * w_g + s[:, 2:3] * sh[:, N:]  # shift
    w_pow = jnp.exp(gamma * jnp.log(w_t + _EPS))                           # sharpen
    return w_pow / (jnp.sum(w_pow, axis=-1, keepdims=True) + _EPS)


def _ntm_step_fused(x, read, w_r_prev, w_w_prev, h, c, mem,
                    w_xh, w_rh, w_hh, b_lstm, w_hproj, b_hproj, shift_mat,
                    fc_params, output_layer):
    H = h.shape[1]
    N, M = mem.shape[1], mem.shape[2]
    R = M + 6                                         # per-head packed proj width

    # --- Controller: LSTM cell over cat([x, prev_read]) (concat folded into
    #     block-partitioned input weights).
    gates = (jnp.dot(x, w_xh, preferred_element_type=jnp.float32)
             + jnp.dot(read, w_rh, preferred_element_type=jnp.float32)
             + jnp.dot(h, w_hh, preferred_element_type=jnp.float32)
             + b_lstm)
    i_g = jax.nn.sigmoid(gates[:, 0 * H:1 * H])       # PyTorch gate order i, f, g, o
    f_g = jax.nn.sigmoid(gates[:, 1 * H:2 * H])
    g_g = jnp.tanh(gates[:, 2 * H:3 * H])
    o_g = jax.nn.sigmoid(gates[:, 3 * H:4 * H])
    c_new = f_g * c + i_g * g_g
    h_new = o_g * jnp.tanh(c_new)

    # --- ONE fused matmul for every h_new-sourced projection:
    #     [r_proj | w_proj | erase/add | fc-or-fm head]
    hp = jnp.dot(h_new, w_hproj, preferred_element_type=jnp.float32) + b_hproj

    # --- Memory norms shared by both heads (hoisted out of addressing).
    mem_e = mem + _EPS
    mem_norm = jnp.maximum(jnp.sqrt(jnp.sum(mem_e * mem_e, axis=-1)), 1e-8)  # (B, N)

    w_r = _addressing_fused(hp[:, 0:R], w_r_prev, mem_e, mem_norm, shift_mat)
    w_w = _addressing_fused(hp[:, R:2 * R], w_w_prev, mem_e, mem_norm, shift_mat)

    # --- Read (pre-write memory), then erase/add write.
    read_new = jnp.sum(w_r[:, :, None] * mem, axis=1)                        # (B, M)
    ea = hp[:, 2 * R:2 * R + 2 * M]
    e = jax.nn.sigmoid(ea[:, :M])
    a = ea[:, M:]
    mem_new = (mem * (1.0 - w_w[:, :, None] * e[:, None, :])
               + w_w[:, :, None] * a[:, None, :])

    # --- Output layer over cat([h_new, read_new]).
    off = 2 * R + 2 * M
    if output_layer == 'fm':
        w_read_fm, w_h2, w_r2, fm_b = fc_params
        K = w_h2.shape[1]
        rp = jnp.dot(read_new, w_read_fm, preferred_element_type=jnp.float32)  # (B, K+1)
        xw = hp[:, off:off + K] + rp[:, :K]
        out_lin = hp[:, off + K:off + K + 1] + rp[:, K:K + 1]
        x2w2 = (jnp.dot(h_new * h_new, w_h2, preferred_element_type=jnp.float32)
                + jnp.dot(read_new * read_new, w_r2, preferred_element_type=jnp.float32))
        out_1 = jnp.sum(xw * xw, axis=1, keepdims=True) + fm_b
        out_2 = jnp.sum(x2w2, axis=1, keepdims=True)
        y = 0.5 * (out_1 - out_2) + out_lin
    else:  # nn.Linear(hidden + M, output_length); fc_wh/fc_b folded into hp.
        (w_read_out,) = fc_params
        y = hp[:, off:] + jnp.dot(read_new, w_read_out, preferred_element_type=jnp.float32)
    out = jax.nn.sigmoid(y)                           # default activation = sigmoid

    return out, read_new, w_r, w_w, h_new, c_new, mem_new


# ----------------------------------------------------------------------------
# Pallas kernel (grid over timesteps, state carried in VMEM scratch)
# ----------------------------------------------------------------------------
_NUM_FC_INPUTS = {'fc': 1, 'fm': 4}
_NUM_OUTPUTS = 7
_NUM_SCRATCH = 6


def _make_seq_kernel(output_layer):
    n_fc = _NUM_FC_INPUTS[output_layer]

    def kernel(x_ref, read0_ref, wr0_ref, ww0_ref, h0_ref, c0_ref, mem0_ref,
               w_xh_ref, w_rh_ref, w_hh_ref, b_lstm_ref,
               w_hproj_ref, b_hproj_ref, shift_ref, *rest):
        fc_refs = rest[:n_fc]
        (y_ref, read_out, wr_out, ww_out,
         h_out, c_out, mem_out) = rest[n_fc:n_fc + _NUM_OUTPUTS]
        (read_s, wr_s, ww_s, h_s, c_s, mem_s) = rest[n_fc + _NUM_OUTPUTS:]

        t = pl.program_id(0)

        @pl.when(t == 0)
        def _init():                                  # load initial recurrent state
            read_s[...] = read0_ref[...]
            wr_s[...] = wr0_ref[...]
            ww_s[...] = ww0_ref[...]
            h_s[...] = h0_ref[...]
            c_s[...] = c0_ref[...]
            mem_s[...] = mem0_ref[...]

        (y, read_n, w_r, w_w, h_n, c_n, mem_n) = _ntm_step_fused(
            x_ref[...], read_s[...], wr_s[...], ww_s[...],
            h_s[...], c_s[...], mem_s[...],
            w_xh_ref[...], w_rh_ref[...], w_hh_ref[...], b_lstm_ref[...],
            w_hproj_ref[...], b_hproj_ref[...], shift_ref[...],
            tuple(r[...] for r in fc_refs), output_layer)

        y_ref[...] = y                                # per-step output (blocked over T)
        read_s[...] = read_n                          # carry state in VMEM scratch
        wr_s[...] = w_r
        ww_s[...] = w_w
        h_s[...] = h_n
        c_s[...] = c_n
        mem_s[...] = mem_n

        @pl.when(t == pl.num_programs(0) - 1)
        def _final():                                 # write final state once
            read_out[...] = read_n
            wr_out[...] = w_r
            ww_out[...] = w_w
            h_out[...] = h_n
            c_out[...] = c_n
            mem_out[...] = mem_n

    return kernel


# ----------------------------------------------------------------------------
# Wrapper: weight fusion + pallas_call
# ----------------------------------------------------------------------------
def _pack_params(params, output_layer, N, M):
    """Concatenate every h_new-sourced weight into one (H, TOT) matrix, build the
    constant circular-shift gather matrix, and gather the read-sourced weights."""
    w_blocks = [params['r_proj_w'], params['w_proj_w'], params['ea_w']]
    b_blocks = [params['r_proj_b'], params['w_proj_b'], params['ea_b']]
    if output_layer == 'fm':
        K = params['fm_wh'].shape[1]
        w_blocks += [params['fm_wh'], params['fm_lwh']]
        b_blocks += [jnp.zeros((1, K), jnp.float32), params['fm_lb']]
        extra = [jnp.concatenate([params['fm_wr'], params['fm_lwr']], axis=1),
                 params['fm_wh'] ** 2, params['fm_wr'] ** 2, params['fm_b']]
        out_len = 1
    else:
        w_blocks += [params['fc_wh']]
        b_blocks += [params['fc_b']]
        extra = [params['fc_wr']]
        out_len = params['fc_wh'].shape[1]
    w_hproj = jnp.concatenate(w_blocks, axis=1)
    b_hproj = jnp.concatenate(b_blocks, axis=1)

    # (w @ P_prev)[:, i] = w[:, (i-1) mod N] ; (w @ P_next)[:, i] = w[:, (i+1) mod N]
    idx = jnp.arange(N)
    p_prev = (idx[:, None] == jnp.mod(idx[None, :] - 1, N)).astype(jnp.float32)
    p_next = (idx[:, None] == jnp.mod(idx[None, :] + 1, N)).astype(jnp.float32)
    shift_mat = jnp.concatenate([p_prev, p_next], axis=1)      # (N, 2N)
    return w_hproj, b_hproj, shift_mat, extra, out_len


def _const_spec(shape):
    nd = len(shape)
    return pl.BlockSpec(shape, lambda t: (0,) * nd)


def ntm_forward_seq(xs, previous_state, memory, params, output_layer='fc'):
    """Run T fused NTM steps.  xs: (T, B, V).
    Returns (ys (T, B, out_len), final_state, final_memory)."""
    prev_read, prev_wr, prev_ww, (h, c) = previous_state
    T, B, V = xs.shape
    N, M = memory.shape[1], memory.shape[2]
    H = h.shape[1]
    w_hproj, b_hproj, shift_mat, extra, out_len = _pack_params(params, output_layer, N, M)

    inputs = [xs, prev_read, prev_wr, prev_ww, h, c, memory,
              params['w_xh'], params['w_rh'], params['w_hh'], params['b_lstm'],
              w_hproj, b_hproj, shift_mat] + extra

    in_specs = ([pl.BlockSpec((None, B, V), lambda t: (t, 0, 0))]      # x: blocked over T
                + [_const_spec(a.shape) for a in inputs[1:]])          # rest: resident

    out_shape = (
        jax.ShapeDtypeStruct((T, B, out_len), jnp.float32),   # per-step activation(fc(.))
        jax.ShapeDtypeStruct((B, M), jnp.float32),            # final read vector
        jax.ShapeDtypeStruct((B, N), jnp.float32),            # final read-head weights
        jax.ShapeDtypeStruct((B, N), jnp.float32),            # final write-head weights
        jax.ShapeDtypeStruct((B, H), jnp.float32),            # final controller h
        jax.ShapeDtypeStruct((B, H), jnp.float32),            # final controller c
        jax.ShapeDtypeStruct((B, N, M), jnp.float32),         # final memory
    )
    out_specs = tuple(
        [pl.BlockSpec((None, B, out_len), lambda t: (t, 0, 0))]
        + [_const_spec(s.shape) for s in out_shape[1:]])

    scratch_shapes = [
        pltpu.VMEM((B, M), jnp.float32),        # read
        pltpu.VMEM((B, N), jnp.float32),        # read-head weights
        pltpu.VMEM((B, N), jnp.float32),        # write-head weights
        pltpu.VMEM((B, H), jnp.float32),        # h
        pltpu.VMEM((B, H), jnp.float32),        # c
        pltpu.VMEM((B, N, M), jnp.float32),     # memory
    ]

    outs = pl.pallas_call(
        _make_seq_kernel(output_layer),
        grid=(T,),
        out_shape=out_shape,
        in_specs=in_specs,
        out_specs=out_specs,
        scratch_shapes=scratch_shapes,
        compiler_params=pltpu.CompilerParams(
            dimension_semantics=("arbitrary",)),   # recurrent: state carried across steps
    )(*inputs)

    ys, read, w_r, w_w, h_n, c_n, mem_n = outs
    return ys, (read, w_r, w_w, (h_n, c_n)), mem_n


def ntm_forward(x, previous_state, memory, params, output_layer='fc'):
    """Single NTM step — same semantics as the PyTorch NTM.forward (plus the
    external memory threaded explicitly instead of living in self.memory)."""
    ys, state, mem_new = ntm_forward_seq(x[None], previous_state, memory, params,
                                         output_layer=output_layer)
    return ys[0], state, mem_new


# ----------------------------------------------------------------------------
# Pure-JAX reference (original, unfused formulation) for validation
# ----------------------------------------------------------------------------
def _circular_conv_ref(w, s):
    n = w.shape[1]
    rows = jax.lax.broadcasted_iota(jnp.int32, (n, n), 0)
    cols = jax.lax.broadcasted_iota(jnp.int32, (n, n), 1)
    p_prev = (cols == jnp.mod(rows + 1, n)).astype(w.dtype)
    p_next = (cols == jnp.mod(rows - 1, n)).astype(w.dtype)
    w_m1 = jnp.dot(w, p_prev)
    w_p1 = jnp.dot(w, p_next)
    return s[:, 0:1] * w_m1 + s[:, 1:2] * w + s[:, 2:3] * w_p1


def _head_addressing_ref(h, mem, prev_w, proj_w, proj_b):
    M = mem.shape[2]
    proj = jnp.dot(h, proj_w) + proj_b
    k = proj[:, :M]
    beta = jax.nn.softplus(proj[:, M:M + 1])
    g = jax.nn.sigmoid(proj[:, M + 1:M + 2])
    s = jax.nn.softmax(proj[:, M + 2:M + 5], axis=-1)
    gamma = 1.0 + jax.nn.softplus(proj[:, M + 5:M + 6])
    mem_e = mem + _EPS
    k_e = k[:, None, :] + _EPS
    dots = jnp.sum(mem_e * k_e, axis=-1)
    mem_norm = jnp.sqrt(jnp.sum(mem_e * mem_e, axis=-1))
    k_norm = jnp.sqrt(jnp.sum(k_e * k_e, axis=-1))
    cos = dots / (jnp.maximum(mem_norm, 1e-8) * jnp.maximum(k_norm, 1e-8))
    w_c = jax.nn.softmax(beta * cos, axis=-1)
    w_g = g * w_c + (1.0 - g) * prev_w
    w_t = _circular_conv_ref(w_g, s)
    w_pow = jnp.exp(gamma * jnp.log(w_t + _EPS))
    return w_pow / (jnp.sum(w_pow, axis=-1, keepdims=True) + _EPS)


def ntm_step_ref(x, prev_read, prev_wr, prev_ww, h, c, mem, params, output_layer='fc'):
    H = h.shape[1]
    M = mem.shape[2]
    gates = (jnp.dot(x, params['w_xh']) + jnp.dot(prev_read, params['w_rh'])
             + jnp.dot(h, params['w_hh']) + params['b_lstm'])
    i_g = jax.nn.sigmoid(gates[:, 0 * H:1 * H])
    f_g = jax.nn.sigmoid(gates[:, 1 * H:2 * H])
    g_g = jnp.tanh(gates[:, 2 * H:3 * H])
    o_g = jax.nn.sigmoid(gates[:, 3 * H:4 * H])
    c_new = f_g * c + i_g * g_g
    h_new = o_g * jnp.tanh(c_new)

    w_r = _head_addressing_ref(h_new, mem, prev_wr, params['r_proj_w'], params['r_proj_b'])
    read = jnp.sum(w_r[:, :, None] * mem, axis=1)
    w_w = _head_addressing_ref(h_new, mem, prev_ww, params['w_proj_w'], params['w_proj_b'])
    ea = jnp.dot(h_new, params['ea_w']) + params['ea_b']
    e = jax.nn.sigmoid(ea[:, :M])
    a = ea[:, M:2 * M]
    mem_new = (mem * (1.0 - w_w[:, :, None] * e[:, None, :])
               + w_w[:, :, None] * a[:, None, :])

    if output_layer == 'fm':
        xw = jnp.dot(h_new, params['fm_wh']) + jnp.dot(read, params['fm_wr'])
        out_1 = jnp.sum(xw * xw, axis=1, keepdims=True) + params['fm_b']
        x2w2 = (jnp.dot(h_new * h_new, params['fm_wh'] ** 2)
                + jnp.dot(read * read, params['fm_wr'] ** 2))
        out_2 = jnp.sum(x2w2, axis=1, keepdims=True)
        out_lin = (jnp.dot(h_new, params['fm_lwh']) + jnp.dot(read, params['fm_lwr'])
                   + params['fm_lb'])
        y = 0.5 * (out_1 - out_2) + out_lin
    else:
        y = jnp.dot(h_new, params['fc_wh']) + jnp.dot(read, params['fc_wr']) + params['fc_b']
    out = jax.nn.sigmoid(y)
    return out, read, w_r, w_w, h_new, c_new, mem_new


def ntm_forward_seq_ref(xs, previous_state, memory, params, output_layer='fc'):
    prev_read, prev_wr, prev_ww, (h, c) = previous_state
    mem = memory
    ys = []
    for t in range(xs.shape[0]):
        (y, prev_read, prev_wr, prev_ww, h, c, mem) = ntm_step_ref(
            xs[t], prev_read, prev_wr, prev_ww, h, c, mem, params, output_layer)
        ys.append(y)
    return jnp.stack(ys, axis=0), (prev_read, prev_wr, prev_ww, (h, c)), mem


# ----------------------------------------------------------------------------
# Demo / self-test
# ----------------------------------------------------------------------------
if __name__ == "__main__":
    B, V, H = 2, 8, 32        # batch, vector_length, hidden_size
    N, M = 8, 16              # memory_size = (N, M)
    OUT = 1                   # output_length
    K_FM = 5                  # FM latent dim
    T = 6                     # fused sequence length

    key = jax.random.PRNGKey(0)
    keys = iter(jax.random.split(key, 40))

    def rnd(shape, scale=0.1):
        return (scale * jax.random.normal(next(keys), shape)).astype(jnp.float32)

    params = {
        # Controller LSTM; input weights block-partitioned over [x | prev_read]
        'w_xh': rnd((V, 4 * H)), 'w_rh': rnd((M, 4 * H)),
        'w_hh': rnd((H, 4 * H)), 'b_lstm': rnd((1, 4 * H)),
        # Read head: packed [k(M) | beta(1) | g(1) | s(3) | gamma(1)]
        'r_proj_w': rnd((H, M + 6)), 'r_proj_b': rnd((1, M + 6)),
        # Write head addressing + packed [erase(M) | add(M)]
        'w_proj_w': rnd((H, M + 6)), 'w_proj_b': rnd((1, M + 6)),
        'ea_w': rnd((H, 2 * M)), 'ea_b': rnd((1, 2 * M)),
        # Output layer 'fc' (nn.Linear(hidden + M, OUT)), block-partitioned
        'fc_wh': rnd((H, OUT)), 'fc_wr': rnd((M, OUT)), 'fc_b': rnd((1, OUT), 0.01),
        # Output layer 'fm' (FM(hidden + M, k=5)), block-partitioned
        'fm_wh': rnd((H, K_FM)), 'fm_wr': rnd((M, K_FM)), 'fm_b': rnd((1, 1), 0.01),
        'fm_lwh': rnd((H, 1)), 'fm_lwr': rnd((M, 1)), 'fm_lb': rnd((1, 1), 0.01),
    }

    xs = rnd((T, B, V), 1.0)
    prev_read = rnd((B, M), 1.0)
    prev_wr = jax.nn.softmax(rnd((B, N), 1.0), axis=-1)
    prev_ww = jax.nn.softmax(rnd((B, N), 1.0), axis=-1)
    h0 = rnd((B, H), 0.5)
    c0 = rnd((B, H), 0.5)
    memory = jnp.full((B, N, M), 1e-6, jnp.float32) + rnd((B, N, M), 0.1)
    state = (prev_read, prev_wr, prev_ww, (h0, c0))

    def flatten(ys, st, mem):
        read, w_r, w_w, (h, c) = st
        return (ys, read, w_r, w_w, h, c, mem)

    # Fused T-step kernel vs. per-step pure-JAX reference loop, for both heads.
    for layer in ('fc', 'fm'):
        got = ntm_forward_seq(xs, state, memory, params, output_layer=layer)
        jax.block_until_ready(got)
        ref = ntm_forward_seq_ref(xs, state, memory, params, output_layer=layer)
        for g, r in zip(flatten(*got), flatten(*ref)):
            assert g.shape == r.shape and g.dtype == r.dtype
            assert bool(jnp.allclose(g, r, atol=2e-3, rtol=2e-3)), \
                f"sequence mismatch vs reference (output_layer={layer})"

    # Single-step API (matches NTM.forward: one x + previous_state in/out).
    out1, st1, mem1 = ntm_forward(xs[0], state, memory, params, output_layer='fc')
    jax.block_until_ready((out1, st1, mem1))
    ref1 = ntm_step_ref(xs[0], prev_read, prev_wr, prev_ww, h0, c0, memory, params, 'fc')
    got1 = flatten(out1, st1, mem1)
    for g, r in zip(got1, ref1):
        assert g.shape == r.shape and g.dtype == r.dtype
        assert bool(jnp.allclose(g, r, atol=2e-3, rtol=2e-3)), "single-step mismatch"

    print("KERNEL_OK")
</pallas_src>

<mosaic_0001>
module attributes {stable_mosaic.version = 11 : i64} {
  func.func @kernel(%arg0: i32, %arg1: memref<1x2x8xf32, #tpu.memory_space<vmem>>, %arg2: memref<2x16xf32, #tpu.memory_space<vmem>>, %arg3: memref<2x8xf32, #tpu.memory_space<vmem>>, %arg4: memref<2x8xf32, #tpu.memory_space<vmem>>, %arg5: memref<2x32xf32, #tpu.memory_space<vmem>>, %arg6: memref<2x32xf32, #tpu.memory_space<vmem>>, %arg7: memref<2x8x16xf32, #tpu.memory_space<vmem>>, %arg8: memref<8x128xf32, #tpu.memory_space<vmem>>, %arg9: memref<16x128xf32, #tpu.memory_space<vmem>>, %arg10: memref<32x128xf32, #tpu.memory_space<vmem>>, %arg11: memref<1x128xf32, #tpu.memory_space<vmem>>, %arg12: memref<32x77xf32, #tpu.memory_space<vmem>>, %arg13: memref<1x77xf32, #tpu.memory_space<vmem>>, %arg14: memref<8x16xf32, #tpu.memory_space<vmem>>, %arg15: memref<16x1xf32, #tpu.memory_space<vmem>>, %arg16: memref<1x2x1xf32, #tpu.memory_space<vmem>>, %arg17: memref<2x16xf32, #tpu.memory_space<vmem>>, %arg18: memref<2x8xf32, #tpu.memory_space<vmem>>, %arg19: memref<2x8xf32, #tpu.memory_space<vmem>>, %arg20: memref<2x32xf32, #tpu.memory_space<vmem>>, %arg21: memref<2x32xf32, #tpu.memory_space<vmem>>, %arg22: memref<2x8x16xf32, #tpu.memory_space<vmem>>, %arg23: memref<2x16xf32, #tpu.memory_space<vmem>>, %arg24: memref<2x8xf32, #tpu.memory_space<vmem>>, %arg25: memref<2x8xf32, #tpu.memory_space<vmem>>, %arg26: memref<2x32xf32, #tpu.memory_space<vmem>>, %arg27: memref<2x32xf32, #tpu.memory_space<vmem>>, %arg28: memref<2x8x16xf32, #tpu.memory_space<vmem>>) attributes {dimension_semantics = [#tpu.dimension_semantics<arbitrary>], iteration_bounds = array<i64: 6>, scalar_prefetch = 0 : i64, scratch_operands = 6 : i64, tpu.core_type = #tpu.core_type<tc>, window_params = [{transform_indices = @transform_0, window_bounds = array<i64: 1, 2, 8>}, {pipeline_mode = #tpu.pipeline_mode<synchronous>, transform_indices = @transform_1, window_bounds = array<i64: 2, 16>}, {pipeline_mode = #tpu.pipeline_mode<synchronous>, transform_indices = @transform_2, window_bounds = array<i64: 2, 8>}, {pipeline_mode = #tpu.pipeline_mode<synchronous>, transform_indices = @transform_3, window_bounds = array<i64: 2, 8>}, {pipeline_mode = #tpu.pipeline_mode<synchronous>, transform_indices = @transform_4, window_bounds = array<i64: 2, 32>}, {pipeline_mode = #tpu.pipeline_mode<synchronous>, transform_indices = @transform_5, window_bounds = array<i64: 2, 32>}, {pipeline_mode = #tpu.pipeline_mode<synchronous>, transform_indices = @transform_6, window_bounds = array<i64: 2, 8, 16>}, {pipeline_mode = #tpu.pipeline_mode<synchronous>, transform_indices = @transform_7, window_bounds = array<i64: 8, 128>}, {pipeline_mode = #tpu.pipeline_mode<synchronous>, transform_indices = @transform_8, window_bounds = array<i64: 16, 128>}, {pipeline_mode = #tpu.pipeline_mode<synchronous>, transform_indices = @transform_9, window_bounds = array<i64: 32, 128>}, {pipeline_mode = #tpu.pipeline_mode<synchronous>, transform_indices = @transform_10, window_bounds = array<i64: 1, 128>}, {pipeline_mode = #tpu.pipeline_mode<synchronous>, transform_indices = @transform_11, window_bounds = array<i64: 32, 77>}, {pipeline_mode = #tpu.pipeline_mode<synchronous>, transform_indices = @transform_12, window_bounds = array<i64: 1, 77>}, {pipeline_mode = #tpu.pipeline_mode<synchronous>, transform_indices = @transform_13, window_bounds = array<i64: 8, 16>}, {pipeline_mode = #tpu.pipeline_mode<synchronous>, transform_indices = @transform_14, window_bounds = array<i64: 16, 1>}, {transform_indices = @transform_15, window_bounds = array<i64: 1, 2, 1>}, {pipeline_mode = #tpu.pipeline_mode<synchronous>, transform_indices = @transform_16, window_bounds = array<i64: 2, 16>}, {pipeline_mode = #tpu.pipeline_mode<synchronous>, transform_indices = @transform_17, window_bounds = array<i64: 2, 8>}, {pipeline_mode = #tpu.pipeline_mode<synchronous>, transform_indices = @transform_18, window_bounds = array<i64: 2, 8>}, {pipeline_mode = #tpu.pipeline_mode<synchronous>, transform_indices = @transform_19, window_bounds = array<i64: 2, 32>}, {pipeline_mode = #tpu.pipeline_mode<synchronous>, transform_indices = @transform_20, window_bounds = array<i64: 2, 32>}, {pipeline_mode = #tpu.pipeline_mode<synchronous>, transform_indices = @transform_21, window_bounds = array<i64: 2, 8, 16>}]} {
    %c0_i32 = arith.constant 0 : i32
    %0 = arith.cmpi eq, %arg0, %c0_i32 : i32
    %1 = arith.extui %0 : i1 to i32
    %c0_i32_0 = arith.constant 0 : i32
    %2 = arith.cmpi ne, %1, %c0_i32_0 : i32
    scf.if %2 {
      %c0_105 = arith.constant 0 : index
      %c0_106 = arith.constant 0 : index
      %333 = vector.load %arg2[%c0_105, %c0_106] : memref<2x16xf32, #tpu.memory_space<vmem>>, vector<2x16xf32>
      %c0_107 = arith.constant 0 : index
      %c0_108 = arith.constant 0 : index
      %334 = vector.load %arg23[%c0_107, %c0_108] : memref<2x16xf32, #tpu.memory_space<vmem>>, vector<2x16xf32>
      tpu.vector_store %arg23[%c0_107, %c0_108], %333 {strides = array<i32>} : memref<2x16xf32, #tpu.memory_space<vmem>>, vector<2x16xf32>,
      %c0_109 = arith.constant 0 : index
      %c0_110 = arith.constant 0 : index
      %335 = vector.load %arg3[%c0_109, %c0_110] : memref<2x8xf32, #tpu.memory_space<vmem>>, vector<2x8xf32>
      %c0_111 = arith.constant 0 : index
      %c0_112 = arith.constant 0 : index
      %336 = vector.load %arg24[%c0_111, %c0_112] : memref<2x8xf32, #tpu.memory_space<vmem>>, vector<2x8xf32>
      tpu.vector_store %arg24[%c0_111, %c0_112], %335 {strides = array<i32>} : memref<2x8xf32, #tpu.memory_space<vmem>>, vector<2x8xf32>,
      %c0_113 = arith.constant 0 : index
      %c0_114 = arith.constant 0 : index
      %337 = vector.load %arg4[%c0_113, %c0_114] : memref<2x8xf32, #tpu.memory_space<vmem>>, vector<2x8xf32>
      %c0_115 = arith.constant 0 : index
      %c0_116 = arith.constant 0 : index
      %338 = vector.load %arg25[%c0_115, %c0_116] : memref<2x8xf32, #tpu.memory_space<vmem>>, vector<2x8xf32>
      tpu.vector_store %arg25[%c0_115, %c0_116], %337 {strides = array<i32>} : memref<2x8xf32, #tpu.memory_space<vmem>>, vector<2x8xf32>,
      %c0_117 = arith.constant 0 : index
      %c0_118 = arith.constant 0 : index
      %339 = vector.load %arg5[%c0_117, %c0_118] : memref<2x32xf32, #tpu.memory_space<vmem>>, vector<2x32xf32>
      %c0_119 = arith.constant 0 : index
      %c0_120 = arith.constant 0 : index
      %340 = vector.load %arg26[%c0_119, %c0_120] : memref<2x32xf32, #tpu.memory_space<vmem>>, vector<2x32xf32>
      tpu.vector_store %arg26[%c0_119, %c0_120], %339 {strides = array<i32>} : memref<2x32xf32, #tpu.memory_space<vmem>>, vector<2x32xf32>,
      %c0_121 = arith.constant 0 : index
      %c0_122 = arith.constant 0 : index
      %341 = vector.load %arg6[%c0_121, %c0_122] : memref<2x32xf32, #tpu.memory_space<vmem>>, vector<2x32xf32>
      %c0_123 = arith.constant 0 : index
      %c0_124 = arith.constant 0 : index
      %342 = vector.load %arg27[%c0_123, %c0_124] : memref<2x32xf32, #tpu.memory_space<vmem>>, vector<2x32xf32>
      tpu.vector_store %arg27[%c0_123, %c0_124], %341 {strides = array<i32>} : memref<2x32xf32, #tpu.memory_space<vmem>>, vector<2x32xf32>,
      %c0_125 = arith.constant 0 : index
      %c0_126 = arith.constant 0 : index
      %c0_127 = arith.constant 0 : index
      %343 = vector.load %arg7[%c0_125, %c0_126, %c0_127] : memref<2x8x16xf32, #tpu.memory_space<vmem>>, vector<2x8x16xf32>
      %c0_128 = arith.constant 0 : index
      %c0_129 = arith.constant 0 : index
      %c0_130 = arith.constant 0 : index
      %344 = vector.load %arg28[%c0_128, %c0_129, %c0_130] : memref<2x8x16xf32, #tpu.memory_space<vmem>>, vector<2x8x16xf32>
      tpu.vector_store %arg28[%c0_128, %c0_129, %c0_130], %343 {strides = array<i32>} : memref<2x8x16xf32, #tpu.memory_space<vmem>>, vector<2x8x16xf32>,
    } else {
    }
    %c0 = arith.constant 0 : index
    %c0_1 = arith.constant 0 : index
    %c0_2 = arith.constant 0 : index
    %3 = vector.load %arg1[%c0, %c0_1, %c0_2] : memref<1x2x8xf32, #tpu.memory_space<vmem>>, vector<1x2x8xf32>
    %4 = vector.shape_cast %3 : vector<1x2x8xf32> to vector<2x8xf32>
    %c0_3 = arith.constant 0 : index
    %c0_4 = arith.constant 0 : index
    %5 = vector.load %arg23[%c0_3, %c0_4] : memref<2x16xf32, #tpu.memory_space<vmem>>, vector<2x16xf32>
    %c0_5 = arith.constant 0 : index
    %c0_6 = arith.constant 0 : index
    %6 = vector.load %arg24[%c0_5, %c0_6] : memref<2x8xf32, #tpu.memory_space<vmem>>, vector<2x8xf32>
    %c0_7 = arith.constant 0 : index
    %c0_8 = arith.constant 0 : index
    %7 = vector.load %arg25[%c0_7, %c0_8] : memref<2x8xf32, #tpu.memory_space<vmem>>, vector<2x8xf32>
    %c0_9 = arith.constant 0 : index
    %c0_10 = arith.constant 0 : index
    %8 = vector.load %arg26[%c0_9, %c0_10] : memref<2x32xf32, #tpu.memory_space<vmem>>, vector<2x32xf32>
    %c0_11 = arith.constant 0 : index
    %c0_12 = arith.constant 0 : index
    %9 = vector.load %arg27[%c0_11, %c0_12] : memref<2x32xf32, #tpu.memory_space<vmem>>, vector<2x32xf32>
    %c0_13 = arith.constant 0 : index
    %c0_14 = arith.constant 0 : index
    %c0_15 = arith.constant 0 : index
    %10 = vector.load %arg28[%c0_13, %c0_14, %c0_15] : memref<2x8x16xf32, #tpu.memory_space<vmem>>, vector<2x8x16xf32>
    %c0_16 = arith.constant 0 : index
    %c0_17 = arith.constant 0 : index
    %11 = vector.load %arg8[%c0_16, %c0_17] : memref<8x128xf32, #tpu.memory_space<vmem>>, vector<8x128xf32>
    %c0_18 = arith.constant 0 : index
    %c0_19 = arith.constant 0 : index
    %12 = vector.load %arg9[%c0_18, %c0_19] : memref<16x128xf32, #tpu.memory_space<vmem>>, vector<16x128xf32>
    %c0_20 = arith.constant 0 : index
    %c0_21 = arith.constant 0 : index
    %13 = vector.load %arg10[%c0_20, %c0_21] : memref<32x128xf32, #tpu.memory_space<vmem>>, vector<32x128xf32>
    %c0_22 = arith.constant 0 : index
    %c0_23 = arith.constant 0 : index
    %14 = vector.load %arg11[%c0_22, %c0_23] : memref<1x128xf32, #tpu.memory_space<vmem>>, vector<1x128xf32>
    %c0_24 = arith.constant 0 : index
    %c0_25 = arith.constant 0 : index
    %15 = vector.load %arg12[%c0_24, %c0_25] : memref<32x77xf32, #tpu.memory_space<vmem>>, vector<32x77xf32>
    %c0_26 = arith.constant 0 : index
    %c0_27 = arith.constant 0 : index
    %16 = vector.load %arg13[%c0_26, %c0_27] : memref<1x77xf32, #tpu.memory_space<vmem>>, vector<1x77xf32>
    %c0_28 = arith.constant 0 : index
    %c0_29 = arith.constant 0 : index
    %17 = vector.load %arg14[%c0_28, %c0_29] : memref<8x16xf32, #tpu.memory_space<vmem>>, vector<8x16xf32>
    %c0_30 = arith.constant 0 : index
    %c0_31 = arith.constant 0 : index
    %18 = vector.load %arg15[%c0_30, %c0_31] : memref<16x1xf32, #tpu.memory_space<vmem>>, vector<16x1xf32>
    %cst = arith.constant dense<0.000000e+00> : vector<2x128xf32>
    %19 = tpu.matmul %4, %11, %cst {dimension_numbers = #tpu.dot_dimension_numbers<[1], [0], [0], [1], [0, 0, 1, 1], [], []>} : vector<2x8xf32>, vector<8x128xf32>, vector<2x128xf32> -> vector<2x128xf32>
    %cst_32 = arith.constant dense<0.000000e+00> : vector<2x128xf32>
    %20 = tpu.matmul %5, %12, %cst_32 {dimension_numbers = #tpu.dot_dimension_numbers<[1], [0], [0], [1], [0, 0, 1, 1], [], []>} : vector<2x16xf32>, vector<16x128xf32>, vector<2x128xf32> -> vector<2x128xf32>
    %21 = arith.addf %19, %20 : vector<2x128xf32>
    %cst_33 = arith.constant dense<0.000000e+00> : vector<2x128xf32>
    %22 = tpu.matmul %8, %13, %cst_33 {dimension_numbers = #tpu.dot_dimension_numbers<[1], [0], [0], [1], [0, 0, 1, 1], [], []>} : vector<2x32xf32>, vector<32x128xf32>, vector<2x128xf32> -> vector<2x128xf32>
    %23 = arith.addf %21, %22 : vector<2x128xf32>
    %24 = vector.broadcast %14 : vector<1x128xf32> to vector<2x128xf32>
    %25 = arith.addf %23, %24 : vector<2x128xf32>
    %26 = vector.extract_strided_slice %25 {offsets = [0, 0], sizes = [2, 32], strides = [1, 1]} : vector<2x128xf32> to vector<2x32xf32>
    %27 = arith.negf %26 : vector<2x32xf32>
    %28 = math.exp %27 : vector<2x32xf32>
    %cst_34 = arith.constant 1.000000e+00 : f32
    %29 = vector.broadcast %cst_34 : f32 to vector<2x32xf32>
    %30 = arith.addf %29, %28 : vector<2x32xf32>
    %31 = arith.divf %29, %30 : vector<2x32xf32>
    %32 = vector.extract_strided_slice %25 {offsets = [0, 32], sizes = [2, 32], strides = [1, 1]} : vector<2x128xf32> to vector<2x32xf32>
    %33 = arith.negf %32 : vector<2x32xf32>
    %34 = math.exp %33 : vector<2x32xf32>
    %cst_35 = arith.constant 1.000000e+00 : f32
    %35 = vector.broadcast %cst_35 : f32 to vector<2x32xf32>
    %36 = arith.addf %35, %34 : vector<2x32xf32>
    %37 = arith.divf %35, %36 : vector<2x32xf32>
    %38 = vector.extract_strided_slice %25 {offsets = [0, 64], sizes = [2, 32], strides = [1, 1]} : vector<2x128xf32> to vector<2x32xf32>
    %39 = math.tanh %38 : vector<2x32xf32>
    %40 = vector.extract_strided_slice %25 {offsets = [0, 96], sizes = [2, 32], strides = [1, 1]} : vector<2x128xf32> to vector<2x32xf32>
    %41 = arith.negf %40 : vector<2x32xf32>
    %42 = math.exp %41 : vector<2x32xf32>
    %cst_36 = arith.constant 1.000000e+00 : f32
    %43 = vector.broadcast %cst_36 : f32 to vector<2x32xf32>
    %44 = arith.addf %43, %42 : vector<2x32xf32>
    %45 = arith.divf %43, %44 : vector<2x32xf32>
    %46 = arith.mulf %37, %9 : vector<2x32xf32>
    %47 = arith.mulf %31, %39 : vector<2x32xf32>
    %48 = arith.addf %46, %47 : vector<2x32xf32>
    %49 = math.tanh %48 : vector<2x32xf32>
    %50 = arith.mulf %45, %49 : vector<2x32xf32>
    %cst_37 = arith.constant dense<0.000000e+00> : vector<2x77xf32>
    %51 = tpu.matmul %50, %15, %cst_37 {dimension_numbers = #tpu.dot_dimension_numbers<[1], [0], [0], [1], [0, 0, 1, 1], [], []>} : vector<2x32xf32>, vector<32x77xf32>, vector<2x77xf32> -> vector<2x77xf32>
    %52 = vector.broadcast %16 : vector<1x77xf32> to vector<2x77xf32>
    %53 = arith.addf %51, %52 : vector<2x77xf32>
    %cst_38 = arith.constant 1.000000e-16 : f32
    %54 = vector.broadcast %cst_38 : f32 to vector<2x8x16xf32>
    %55 = arith.addf %10, %54 : vector<2x8x16xf32>
    %56 = arith.mulf %55, %55 : vector<2x8x16xf32>
    %cst_39 = arith.constant dense<0.000000e+00> : vector<2x8xf32>
    %57 = vector.multi_reduction <add>, %56, %cst_39 [2] : vector<2x8x16xf32> to vector<2x8xf32>
    %58 = math.sqrt %57 : vector<2x8xf32>
    %cst_40 = arith.constant 9.99999993E-9 : f32
    %59 = vector.broadcast %cst_40 : f32 to vector<2x8xf32>
    %60 = arith.maximumf %58, %59 : vector<2x8xf32>
    %61 = vector.extract_strided_slice %53 {offsets = [0, 0], sizes = [2, 22], strides = [1, 1]} : vector<2x77xf32> to vector<2x22xf32>
    %62 = vector.extract_strided_slice %61 {offsets = [0, 0], sizes = [2, 16], strides = [1, 1]} : vector<2x22xf32> to vector<2x16xf32>
    %63 = vector.extract_strided_slice %61 {offsets = [0, 16], sizes = [2, 1], strides = [1, 1]} : vector<2x22xf32> to vector<2x1xf32>
    %cst_41 = arith.constant 0.000000e+00 : f32
    %64 = vector.broadcast %cst_41 : f32 to vector<2x1xf32>
    %65 = arith.maximumf %63, %64 : vector<2x1xf32>
    %66 = vector.broadcast %cst_41 : f32 to vector<2x1xf32>
    %67 = arith.subf %63, %66 : vector<2x1xf32>
    %68 = arith.cmpf one, %67, %67 : vector<2x1xf32>
    %69 = vector.broadcast %cst_41 : f32 to vector<2x1xf32>
    %70 = arith.addf %63, %69 : vector<2x1xf32>
    %71 = math.absf %67 : vector<2x1xf32>
    %cst_42 = arith.constant 0.000000e+00 : f32
    %72 = vector.broadcast %cst_42 : f32 to vector<2x1xf32>
    %73 = arith.subf %72, %71 : vector<2x1xf32>
    %74 = math.exp %73 : vector<2x1xf32>
    %75 = math.log1p %74 : vector<2x1xf32>
    %76 = arith.addf %65, %75 : vector<2x1xf32>
    %77 = arith.select %68, %70, %76 : vector<2x1xi1>, vector<2x1xf32>
    %78 = vector.extract_strided_slice %61 {offsets = [0, 17], sizes = [2, 1], strides = [1, 1]} : vector<2x22xf32> to vector<2x1xf32>
    %79 = arith.negf %78 : vector<2x1xf32>
    %80 = math.exp %79 : vector<2x1xf32>
    %cst_43 = arith.constant 1.000000e+00 : f32
    %81 = vector.broadcast %cst_43 : f32 to vector<2x1xf32>
    %82 = arith.addf %81, %80 : vector<2x1xf32>
    %83 = arith.divf %81, %82 : vector<2x1xf32>
    %84 = vector.extract_strided_slice %61 {offsets = [0, 18], sizes = [2, 3], strides = [1, 1]} : vector<2x22xf32> to vector<2x3xf32>
    %cst_44 = arith.constant dense<0xFF800000> : vector<2xf32>
    %85 = vector.multi_reduction <maximumf>, %84, %cst_44 [1] : vector<2x3xf32> to vector<2xf32>
    %cst_45 = arith.constant 0xFF800000 : f32
    %86 = vector.broadcast %cst_45 : f32 to vector<2xf32>
    %87 = arith.maximumf %86, %85 : vector<2xf32>
    %88 = vector.shape_cast %87 : vector<2xf32> to vector<2x1xf32>
    %89 = vector.broadcast %88 : vector<2x1xf32> to vector<2x3xf32>
    %90 = arith.subf %84, %89 : vector<2x3xf32>
    %91 = math.exp %90 : vector<2x3xf32>
    %cst_46 = arith.constant dense<0.000000e+00> : vector<2xf32>
    %92 = vector.multi_reduction <add>, %91, %cst_46 [1] : vector<2x3xf32> to vector<2xf32>
    %93 = vector.shape_cast %92 : vector<2xf32> to vector<2x1xf32>
    %94 = vector.broadcast %93 : vector<2x1xf32> to vector<2x3xf32>
    %95 = arith.divf %91, %94 : vector<2x3xf32>
    %96 = vector.extract_strided_slice %61 {offsets = [0, 21], sizes = [2, 1], strides = [1, 1]} : vector<2x22xf32> to vector<2x1xf32>
    %cst_47 = arith.constant 0.000000e+00 : f32
    %97 = vector.broadcast %cst_47 : f32 to vector<2x1xf32>
    %98 = arith.maximumf %96, %97 : vector<2x1xf32>
    %99 = vector.broadcast %cst_47 : f32 to vector<2x1xf32>
    %100 = arith.subf %96, %99 : vector<2x1xf32>
    %101 = arith.cmpf one, %100, %100 : vector<2x1xf32>
    %102 = vector.broadcast %cst_47 : f32 to vector<2x1xf32>
    %103 = arith.addf %96, %102 : vector<2x1xf32>
    %104 = math.absf %100 : vector<2x1xf32>
    %cst_48 = arith.constant 0.000000e+00 : f32
    %105 = vector.broadcast %cst_48 : f32 to vector<2x1xf32>
    %106 = arith.subf %105, %104 : vector<2x1xf32>
    %107 = math.exp %106 : vector<2x1xf32>
    %108 = math.log1p %107 : vector<2x1xf32>
    %109 = arith.addf %98, %108 : vector<2x1xf32>
    %110 = arith.select %101, %103, %109 : vector<2x1xi1>, vector<2x1xf32>
    %cst_49 = arith.constant 1.000000e+00 : f32
    %111 = vector.broadcast %cst_49 : f32 to vector<2x1xf32>
    %112 = arith.addf %111, %110 : vector<2x1xf32>
    %cst_50 = arith.constant 1.000000e-16 : f32
    %113 = vector.broadcast %cst_50 : f32 to vector<2x16xf32>
    %114 = arith.addf %62, %113 : vector<2x16xf32>
    %115 = vector.shape_cast %114 : vector<2x16xf32> to vector<2x1x16xf32>
    %116 = vector.broadcast %115 : vector<2x1x16xf32> to vector<2x8x16xf32>
    %117 = arith.mulf %55, %116 : vector<2x8x16xf32>
    %cst_51 = arith.constant dense<0.000000e+00> : vector<2x8xf32>
    %118 = vector.multi_reduction <add>, %117, %cst_51 [2] : vector<2x8x16xf32> to vector<2x8xf32>
    %119 = arith.mulf %114, %114 : vector<2x16xf32>
    %cst_52 = arith.constant dense<0.000000e+00> : vector<2xf32>
    %120 = vector.multi_reduction <add>, %119, %cst_52 [1] : vector<2x16xf32> to vector<2xf32>
    %121 = vector.shape_cast %120 : vector<2xf32> to vector<2x1xf32>
    %122 = math.sqrt %121 : vector<2x1xf32>
    %cst_53 = arith.constant 9.99999993E-9 : f32
    %123 = vector.broadcast %cst_53 : f32 to vector<2x1xf32>
    %124 = arith.maximumf %122, %123 : vector<2x1xf32>
    %125 = vector.broadcast %124 : vector<2x1xf32> to vector<2x8xf32>
    %126 = arith.mulf %60, %125 : vector<2x8xf32>
    %127 = arith.divf %118, %126 : vector<2x8xf32>
    %128 = vector.broadcast %77 : vector<2x1xf32> to vector<2x8xf32>
    %129 = arith.mulf %128, %127 : vector<2x8xf32>
    %cst_54 = arith.constant dense<0xFF800000> : vector<2xf32>
    %130 = vector.multi_reduction <maximumf>, %129, %cst_54 [1] : vector<2x8xf32> to vector<2xf32>
    %cst_55 = arith.constant 0xFF800000 : f32
    %131 = vector.broadcast %cst_55 : f32 to vector<2xf32>
    %132 = arith.maximumf %131, %130 : vector<2xf32>
    %133 = vector.shape_cast %132 : vector<2xf32> to vector<2x1xf32>
    %134 = vector.broadcast %133 : vector<2x1xf32> to vector<2x8xf32>
    %135 = arith.subf %129, %134 : vector<2x8xf32>
    %136 = math.exp %135 : vector<2x8xf32>
    %cst_56 = arith.constant dense<0.000000e+00> : vector<2xf32>
    %137 = vector.multi_reduction <add>, %136, %cst_56 [1] : vector<2x8xf32> to vector<2xf32>
    %138 = vector.shape_cast %137 : vector<2xf32> to vector<2x1xf32>
    %139 = vector.broadcast %138 : vector<2x1xf32> to vector<2x8xf32>
    %140 = arith.divf %136, %139 : vector<2x8xf32>
    %141 = vector.broadcast %83 : vector<2x1xf32> to vector<2x8xf32>
    %142 = arith.mulf %141, %140 : vector<2x8xf32>
    %cst_57 = arith.constant 1.000000e+00 : f32
    %143 = vector.broadcast %cst_57 : f32 to vector<2x1xf32>
    %144 = arith.subf %143, %83 : vector<2x1xf32>
    %145 = vector.broadcast %144 : vector<2x1xf32> to vector<2x8xf32>
    %146 = arith.mulf %145, %6 : vector<2x8xf32>
    %147 = arith.addf %142, %146 : vector<2x8xf32>
    %cst_58 = arith.constant dense<0.000000e+00> : vector<2x16xf32>
    %148 = tpu.matmul %147, %17, %cst_58 {dimension_numbers = #tpu.dot_dimension_numbers<[1], [0], [0], [1], [0, 0, 1, 1], [], []>} : vector<2x8xf32>, vector<8x16xf32>, vector<2x16xf32> -> vector<2x16xf32>
    %149 = vector.extract_strided_slice %95 {offsets = [0, 0], sizes = [2, 1], strides = [1, 1]} : vector<2x3xf32> to vector<2x1xf32>
    %150 = vector.extract_strided_slice %148 {offsets = [0, 0], sizes = [2, 8], strides = [1, 1]} : vector<2x16xf32> to vector<2x8xf32>
    %151 = vector.broadcast %149 : vector<2x1xf32> to vector<2x8xf32>
    %152 = arith.mulf %151, %150 : vector<2x8xf32>
    %153 = vector.extract_strided_slice %95 {offsets = [0, 1], sizes = [2, 1], strides = [1, 1]} : vector<2x3xf32> to vector<2x1xf32>
    %154 = vector.broadcast %153 : vector<2x1xf32> to vector<2x8xf32>
    %155 = arith.mulf %154, %147 : vector<2x8xf32>
    %156 = arith.addf %152, %155 : vector<2x8xf32>
    %157 = vector.extract_strided_slice %95 {offsets = [0, 2], sizes = [2, 1], strides = [1, 1]} : vector<2x3xf32> to vector<2x1xf32>
    %158 = vector.extract_strided_slice %148 {offsets = [0, 8], sizes = [2, 8], strides = [1, 1]} : vector<2x16xf32> to vector<2x8xf32>
    %159 = vector.broadcast %157 : vector<2x1xf32> to vector<2x8xf32>
    %160 = arith.mulf %159, %158 : vector<2x8xf32>
    %161 = arith.addf %156, %160 : vector<2x8xf32>
    %cst_59 = arith.constant 1.000000e-16 : f32
    %162 = vector.broadcast %cst_59 : f32 to vector<2x8xf32>
    %163 = arith.addf %161, %162 : vector<2x8xf32>
    %164 = math.log %163 : vector<2x8xf32>
    %165 = vector.broadcast %112 : vector<2x1xf32> to vector<2x8xf32>
    %166 = arith.mulf %165, %164 : vector<2x8xf32>
    %167 = math.exp %166 : vector<2x8xf32>
    %cst_60 = arith.constant dense<0.000000e+00> : vector<2xf32>
    %168 = vector.multi_reduction <add>, %167, %cst_60 [1] : vector<2x8xf32> to vector<2xf32>
    %169 = vector.shape_cast %168 : vector<2xf32> to vector<2x1xf32>
    %cst_61 = arith.constant 1.000000e-16 : f32
    %170 = vector.broadcast %cst_61 : f32 to vector<2x1xf32>
    %171 = arith.addf %169, %170 : vector<2x1xf32>
    %172 = vector.broadcast %171 : vector<2x1xf32> to vector<2x8xf32>
    %173 = arith.divf %167, %172 : vector<2x8xf32>
    %174 = vector.extract_strided_slice %53 {offsets = [0, 22], sizes = [2, 22], strides = [1, 1]} : vector<2x77xf32> to vector<2x22xf32>
    %175 = vector.extract_strided_slice %174 {offsets = [0, 0], sizes = [2, 16], strides = [1, 1]} : vector<2x22xf32> to vector<2x16xf32>
    %176 = vector.extract_strided_slice %174 {offsets = [0, 16], sizes = [2, 1], strides = [1, 1]} : vector<2x22xf32> to vector<2x1xf32>
    %cst_62 = arith.constant 0.000000e+00 : f32
    %177 = vector.broadcast %cst_62 : f32 to vector<2x1xf32>
    %178 = arith.maximumf %176, %177 : vector<2x1xf32>
    %179 = vector.broadcast %cst_62 : f32 to vector<2x1xf32>
    %180 = arith.subf %176, %179 : vector<2x1xf32>
    %181 = arith.cmpf one, %180, %180 : vector<2x1xf32>
    %182 = vector.broadcast %cst_62 : f32 to vector<2x1xf32>
    %183 = arith.addf %176, %182 : vector<2x1xf32>
    %184 = math.absf %180 : vector<2x1xf32>
    %cst_63 = arith.constant 0.000000e+00 : f32
    %185 = vector.broadcast %cst_63 : f32 to vector<2x1xf32>
    %186 = arith.subf %185, %184 : vector<2x1xf32>
    %187 = math.exp %186 : vector<2x1xf32>
    %188 = math.log1p %187 : vector<2x1xf32>
    %189 = arith.addf %178, %188 : vector<2x1xf32>
    %190 = arith.select %181, %183, %189 : vector<2x1xi1>, vector<2x1xf32>
    %191 = vector.extract_strided_slice %174 {offsets = [0, 17], sizes = [2, 1], strides = [1, 1]} : vector<2x22xf32> to vector<2x1xf32>
    %192 = arith.negf %191 : vector<2x1xf32>
    %193 = math.exp %192 : vector<2x1xf32>
    %cst_64 = arith.constant 1.000000e+00 : f32
    %194 = vector.broadcast %cst_64 : f32 to vector<2x1xf32>
    %195 = arith.addf %194, %193 : vector<2x1xf32>
    %196 = arith.divf %194, %195 : vector<2x1xf32>
    %197 = vector.extract_strided_slice %174 {offsets = [0, 18], sizes = [2, 3], strides = [1, 1]} : vector<2x22xf32> to vector<2x3xf32>
    %cst_65 = arith.constant dense<0xFF800000> : vector<2xf32>
    %198 = vector.multi_reduction <maximumf>, %197, %cst_65 [1] : vector<2x3xf32> to vector<2xf32>
    %cst_66 = arith.constant 0xFF800000 : f32
    %199 = vector.broadcast %cst_66 : f32 to vector<2xf32>
    %200 = arith.maximumf %199, %198 : vector<2xf32>
    %201 = vector.shape_cast %200 : vector<2xf32> to vector<2x1xf32>
    %202 = vector.broadcast %201 : vector<2x1xf32> to vector<2x3xf32>
    %203 = arith.subf %197, %202 : vector<2x3xf32>
    %204 = math.exp %203 : vector<2x3xf32>
    %cst_67 = arith.constant dense<0.000000e+00> : vector<2xf32>
    %205 = vector.multi_reduction <add>, %204, %cst_67 [1] : vector<2x3xf32> to vector<2xf32>
    %206 = vector.shape_cast %205 : vector<2xf32> to vector<2x1xf32>
    %207 = vector.broadcast %206 : vector<2x1xf32> to vector<2x3xf32>
    %208 = arith.divf %204, %207 : vector<2x3xf32>
    %209 = vector.extract_strided_slice %174 {offsets = [0, 21], sizes = [2, 1], strides = [1, 1]} : vector<2x22xf32> to vector<2x1xf32>
    %cst_68 = arith.constant 0.000000e+00 : f32
    %210 = vector.broadcast %cst_68 : f32 to vector<2x1xf32>
    %211 = arith.maximumf %209, %210 : vector<2x1xf32>
    %212 = vector.broadcast %cst_68 : f32 to vector<2x1xf32>
    %213 = arith.subf %209, %212 : vector<2x1xf32>
    %214 = arith.cmpf one, %213, %213 : vector<2x1xf32>
    %215 = vector.broadcast %cst_68 : f32 to vector<2x1xf32>
    %216 = arith.addf %209, %215 : vector<2x1xf32>
    %217 = math.absf %213 : vector<2x1xf32>
    %cst_69 = arith.constant 0.000000e+00 : f32
    %218 = vector.broadcast %cst_69 : f32 to vector<2x1xf32>
    %219 = arith.subf %218, %217 : vector<2x1xf32>
    %220 = math.exp %219 : vector<2x1xf32>
    %221 = math.log1p %220 : vector<2x1xf32>
    %222 = arith.addf %211, %221 : vector<2x1xf32>
    %223 = arith.select %214, %216, %222 : vector<2x1xi1>, vector<2x1xf32>
    %cst_70 = arith.constant 1.000000e+00 : f32
    %224 = vector.broadcast %cst_70 : f32 to vector<2x1xf32>
    %225 = arith.addf %224, %223 : vector<2x1xf32>
    %cst_71 = arith.constant 1.000000e-16 : f32
    %226 = vector.broadcast %cst_71 : f32 to vector<2x16xf32>
    %227 = arith.addf %175, %226 : vector<2x16xf32>
    %228 = vector.shape_cast %227 : vector<2x16xf32> to vector<2x1x16xf32>
    %229 = vector.broadcast %228 : vector<2x1x16xf32> to vector<2x8x16xf32>
    %230 = arith.mulf %55, %229 : vector<2x8x16xf32>
    %cst_72 = arith.constant dense<0.000000e+00> : vector<2x8xf32>
    %231 = vector.multi_reduction <add>, %230, %cst_72 [2] : vector<2x8x16xf32> to vector<2x8xf32>
    %232 = arith.mulf %227, %227 : vector<2x16xf32>
    %cst_73 = arith.constant dense<0.000000e+00> : vector<2xf32>
    %233 = vector.multi_reduction <add>, %232, %cst_73 [1] : vector<2x16xf32> to vector<2xf32>
    %234 = vector.shape_cast %233 : vector<2xf32> to vector<2x1xf32>
    %235 = math.sqrt %234 : vector<2x1xf32>
    %cst_74 = arith.constant 9.99999993E-9 : f32
    %236 = vector.broadcast %cst_74 : f32 to vector<2x1xf32>
    %237 = arith.maximumf %235, %236 : vector<2x1xf32>
    %238 = vector.broadcast %237 : vector<2x1xf32> to vector<2x8xf32>
    %239 = arith.mulf %60, %238 : vector<2x8xf32>
    %240 = arith.divf %231, %239 : vector<2x8xf32>
    %241 = vector.broadcast %190 : vector<2x1xf32> to vector<2x8xf32>
    %242 = arith.mulf %241, %240 : vector<2x8xf32>
    %cst_75 = arith.constant dense<0xFF800000> : vector<2xf32>
    %243 = vector.multi_reduction <maximumf>, %242, %cst_75 [1] : vector<2x8xf32> to vector<2xf32>
    %cst_76 = arith.constant 0xFF800000 : f32
    %244 = vector.broadcast %cst_76 : f32 to vector<2xf32>
    %245 = arith.maximumf %244, %243 : vector<2xf32>
    %246 = vector.shape_cast %245 : vector<2xf32> to vector<2x1xf32>
    %247 = vector.broadcast %246 : vector<2x1xf32> to vector<2x8xf32>
    %248 = arith.subf %242, %247 : vector<2x8xf32>
    %249 = math.exp %248 : vector<2x8xf32>
    %cst_77 = arith.constant dense<0.000000e+00> : vector<2xf32>
    %250 = vector.multi_reduction <add>, %249, %cst_77 [1] : vector<2x8xf32> to vector<2xf32>
    %251 = vector.shape_cast %250 : vector<2xf32> to vector<2x1xf32>
    %252 = vector.broadcast %251 : vector<2x1xf32> to vector<2x8xf32>
    %253 = arith.divf %249, %252 : vector<2x8xf32>
    %254 = vector.broadcast %196 : vector<2x1xf32> to vector<2x8xf32>
    %255 = arith.mulf %254, %253 : vector<2x8xf32>
    %cst_78 = arith.constant 1.000000e+00 : f32
    %256 = vector.broadcast %cst_78 : f32 to vector<2x1xf32>
    %257 = arith.subf %256, %196 : vector<2x1xf32>
    %258 = vector.broadcast %257 : vector<2x1xf32> to vector<2x8xf32>
    %259 = arith.mulf %258, %7 : vector<2x8xf32>
    %260 = arith.addf %255, %259 : vector<2x8xf32>
    %cst_79 = arith.constant dense<0.000000e+00> : vector<2x16xf32>
    %261 = tpu.matmul %260, %17, %cst_79 {dimension_numbers = #tpu.dot_dimension_numbers<[1], [0], [0], [1], [0, 0, 1, 1], [], []>} : vector<2x8xf32>, vector<8x16xf32>, vector<2x16xf32> -> vector<2x16xf32>
    %262 = vector.extract_strided_slice %208 {offsets = [0, 0], sizes = [2, 1], strides = [1, 1]} : vector<2x3xf32> to vector<2x1xf32>
    %263 = vector.extract_strided_slice %261 {offsets = [0, 0], sizes = [2, 8], strides = [1, 1]} : vector<2x16xf32> to vector<2x8xf32>
    %264 = vector.broadcast %262 : vector<2x1xf32> to vector<2x8xf32>
    %265 = arith.mulf %264, %263 : vector<2x8xf32>
    %266 = vector.extract_strided_slice %208 {offsets = [0, 1], sizes = [2, 1], strides = [1, 1]} : vector<2x3xf32> to vector<2x1xf32>
    %267 = vector.broadcast %266 : vector<2x1xf32> to vector<2x8xf32>
    %268 = arith.mulf %267, %260 : vector<2x8xf32>
    %269 = arith.addf %265, %268 : vector<2x8xf32>
    %270 = vector.extract_strided_slice %208 {offsets = [0, 2], sizes = [2, 1], strides = [1, 1]} : vector<2x3xf32> to vector<2x1xf32>
    %271 = vector.extract_strided_slice %261 {offsets = [0, 8], sizes = [2, 8], strides = [1, 1]} : vector<2x16xf32> to vector<2x8xf32>
    %272 = vector.broadcast %270 : vector<2x1xf32> to vector<2x8xf32>
    %273 = arith.mulf %272, %271 : vector<2x8xf32>
    %274 = arith.addf %269, %273 : vector<2x8xf32>
    %cst_80 = arith.constant 1.000000e-16 : f32
    %275 = vector.broadcast %cst_80 : f32 to vector<2x8xf32>
    %276 = arith.addf %274, %275 : vector<2x8xf32>
    %277 = math.log %276 : vector<2x8xf32>
    %278 = vector.broadcast %225 : vector<2x1xf32> to vector<2x8xf32>
    %279 = arith.mulf %278, %277 : vector<2x8xf32>
    %280 = math.exp %279 : vector<2x8xf32>
    %cst_81 = arith.constant dense<0.000000e+00> : vector<2xf32>
    %281 = vector.multi_reduction <add>, %280, %cst_81 [1] : vector<2x8xf32> to vector<2xf32>
    %282 = vector.shape_cast %281 : vector<2xf32> to vector<2x1xf32>
    %cst_82 = arith.constant 1.000000e-16 : f32
    %283 = vector.broadcast %cst_82 : f32 to vector<2x1xf32>
    %284 = arith.addf %282, %283 : vector<2x1xf32>
    %285 = vector.broadcast %284 : vector<2x1xf32> to vector<2x8xf32>
    %286 = arith.divf %280, %285 : vector<2x8xf32>
    %287 = vector.shape_cast %173 : vector<2x8xf32> to vector<2x8x1xf32>
    %288 = vector.broadcast %287 : vector<2x8x1xf32> to vector<2x8x16xf32>
    %289 = arith.mulf %288, %10 : vector<2x8x16xf32>
    %cst_83 = arith.constant dense<0.000000e+00> : vector<2x16xf32>
    %290 = vector.multi_reduction <add>, %289, %cst_83 [1] : vector<2x8x16xf32> to vector<2x16xf32>
    %291 = vector.extract_strided_slice %53 {offsets = [0, 44], sizes = [2, 32], strides = [1, 1]} : vector<2x77xf32> to vector<2x32xf32>
    %292 = vector.extract_strided_slice %291 {offsets = [0, 0], sizes = [2, 16], strides = [1, 1]} : vector<2x32xf32> to vector<2x16xf32>
    %293 = arith.negf %292 : vector<2x16xf32>
    %294 = math.exp %293 : vector<2x16xf32>
    %cst_84 = arith.constant 1.000000e+00 : f32
    %295 = vector.broadcast %cst_84 : f32 to vector<2x16xf32>
    %296 = arith.addf %295, %294 : vector<2x16xf32>
    %297 = arith.divf %295, %296 : vector<2x16xf32>
    %298 = vector.extract_strided_slice %291 {offsets = [0, 16], sizes = [2, 16], strides = [1, 1]} : vector<2x32xf32> to vector<2x16xf32>
    %299 = vector.shape_cast %286 : vector<2x8xf32> to vector<2x8x1xf32>
    %300 = vector.shape_cast %297 : vector<2x16xf32> to vector<2x1x16xf32>
    %301 = vector.broadcast %299 : vector<2x8x1xf32> to vector<2x8x16xf32>
    %302 = vector.broadcast %300 : vector<2x1x16xf32> to vector<2x8x16xf32>
    %303 = arith.mulf %301, %302 : vector<2x8x16xf32>
    %cst_85 = arith.constant 1.000000e+00 : f32
    %304 = vector.broadcast %cst_85 : f32 to vector<2x8x16xf32>
    %305 = arith.subf %304, %303 : vector<2x8x16xf32>
    %306 = arith.mulf %10, %305 : vector<2x8x16xf32>
    %307 = vector.shape_cast %286 : vector<2x8xf32> to vector<2x8x1xf32>
    %308 = vector.shape_cast %298 : vector<2x16xf32> to vector<2x1x16xf32>
    %309 = vector.broadcast %307 : vector<2x8x1xf32> to vector<2x8x16xf32>
    %310 = vector.broadcast %308 : vector<2x1x16xf32> to vector<2x8x16xf32>
    %311 = arith.mulf %309, %310 : vector<2x8x16xf32>
    %312 = arith.addf %306, %311 : vector<2x8x16xf32>
    %313 = vector.extract_strided_slice %53 {offsets = [0, 76], sizes = [2, 1], strides = [1, 1]} : vector<2x77xf32> to vector<2x1xf32>
    %cst_86 = arith.constant dense<0.000000e+00> : vector<2x1xf32>
    %314 = tpu.matmul %290, %18, %cst_86 {dimension_numbers = #tpu.dot_dimension_numbers<[1], [0], [0], [1], [0, 0, 1, 1], [], []>} : vector<2x16xf32>, vector<16x1xf32>, vector<2x1xf32> -> vector<2x1xf32>
    %315 = arith.addf %313, %314 : vector<2x1xf32>
    %316 = arith.negf %315 : vector<2x1xf32>
    %317 = math.exp %316 : vector<2x1xf32>
    %cst_87 = arith.constant 1.000000e+00 : f32
    %318 = vector.broadcast %cst_87 : f32 to vector<2x1xf32>
    %319 = arith.addf %318, %317 : vector<2x1xf32>
    %320 = arith.divf %318, %319 : vector<2x1xf32>
    %c0_88 = arith.constant 0 : index
    %c0_89 = arith.constant 0 : index
    %c0_90 = arith.constant 0 : index
    %321 = vector.load %arg16[%c0_88, %c0_89, %c0_90] : memref<1x2x1xf32, #tpu.memory_space<vmem>>, vector<1x2x1xf32>
    %322 = vector.shape_cast %321 : vector<1x2x1xf32> to vector<2x1xf32>
    %323 = vector.shape_cast %320 : vector<2x1xf32> to vector<1x2x1xf32>
    tpu.vector_store %arg16[%c0_88, %c0_89, %c0_90], %323 {strides = array<i32>} : memref<1x2x1xf32, #tpu.memory_space<vmem>>, vector<1x2x1xf32>,
    %c0_91 = arith.constant 0 : index
    %c0_92 = arith.constant 0 : index
    %324 = vector.load %arg23[%c0_91, %c0_92] : memref<2x16xf32, #tpu.memory_space<vmem>>, vector<2x16xf32>
    tpu.vector_store %arg23[%c0_91, %c0_92], %290 {strides = array<i32>} : memref<2x16xf32, #tpu.memory_space<vmem>>, vector<2x16xf32>,
    %c0_93 = arith.constant 0 : index
    %c0_94 = arith.constant 0 : index
    %325 = vector.load %arg24[%c0_93, %c0_94] : memref<2x8xf32, #tpu.memory_space<vmem>>, vector<2x8xf32>
    tpu.vector_store %arg24[%c0_93, %c0_94], %173 {strides = array<i32>} : memref<2x8xf32, #tpu.memory_space<vmem>>, vector<2x8xf32>,
    %c0_95 = arith.constant 0 : index
    %c0_96 = arith.constant 0 : index
    %326 = vector.load %arg25[%c0_95, %c0_96] : memref<2x8xf32, #tpu.memory_space<vmem>>, vector<2x8xf32>
    tpu.vector_store %arg25[%c0_95, %c0_96], %286 {strides = array<i32>} : memref<2x8xf32, #tpu.memory_space<vmem>>, vector<2x8xf32>,
    %c0_97 = arith.constant 0 : index
    %c0_98 = arith.constant 0 : index
    %327 = vector.load %arg26[%c0_97, %c0_98] : memref<2x32xf32, #tpu.memory_space<vmem>>, vector<2x32xf32>
    tpu.vector_store %arg26[%c0_97, %c0_98], %50 {strides = array<i32>} : memref<2x32xf32, #tpu.memory_space<vmem>>, vector<2x32xf32>,
    %c0_99 = arith.constant 0 : index
    %c0_100 = arith.constant 0 : index
    %328 = vector.load %arg27[%c0_99, %c0_100] : memref<2x32xf32, #tpu.memory_space<vmem>>, vector<2x32xf32>
    tpu.vector_store %arg27[%c0_99, %c0_100], %48 {strides = array<i32>} : memref<2x32xf32, #tpu.memory_space<vmem>>, vector<2x32xf32>,
    %c0_101 = arith.constant 0 : index
    %c0_102 = arith.constant 0 : index
    %c0_103 = arith.constant 0 : index
    %329 = vector.load %arg28[%c0_101, %c0_102, %c0_103] : memref<2x8x16xf32, #tpu.memory_space<vmem>>, vector<2x8x16xf32>
    tpu.vector_store %arg28[%c0_101, %c0_102, %c0_103], %312 {strides = array<i32>} : memref<2x8x16xf32, #tpu.memory_space<vmem>>, vector<2x8x16xf32>,
    %c5_i32 = arith.constant 5 : i32
    %330 = arith.cmpi eq, %arg0, %c5_i32 : i32
    %331 = arith.extui %330 : i1 to i32
    %c0_i32_104 = arith.constant 0 : i32
    %332 = arith.cmpi ne, %331, %c0_i32_104 : i32
    scf.if %332 {
      %c0_105 = arith.constant 0 : index
      %c0_106 = arith.constant 0 : index
      %333 = vector.load %arg17[%c0_105, %c0_106] : memref<2x16xf32, #tpu.memory_space<vmem>>, vector<2x16xf32>
      tpu.vector_store %arg17[%c0_105, %c0_106], %290 {strides = array<i32>} : memref<2x16xf32, #tpu.memory_space<vmem>>, vector<2x16xf32>,
      %c0_107 = arith.constant 0 : index
      %c0_108 = arith.constant 0 : index
      %334 = vector.load %arg18[%c0_107, %c0_108] : memref<2x8xf32, #tpu.memory_space<vmem>>, vector<2x8xf32>
      tpu.vector_store %arg18[%c0_107, %c0_108], %173 {strides = array<i32>} : memref<2x8xf32, #tpu.memory_space<vmem>>, vector<2x8xf32>,
      %c0_109 = arith.constant 0 : index
      %c0_110 = arith.constant 0 : index
      %335 = vector.load %arg19[%c0_109, %c0_110] : memref<2x8xf32, #tpu.memory_space<vmem>>, vector<2x8xf32>
      tpu.vector_store %arg19[%c0_109, %c0_110], %286 {strides = array<i32>} : memref<2x8xf32, #tpu.memory_space<vmem>>, vector<2x8xf32>,
      %c0_111 = arith.constant 0 : index
      %c0_112 = arith.constant 0 : index
      %336 = vector.load %arg20[%c0_111, %c0_112] : memref<2x32xf32, #tpu.memory_space<vmem>>, vector<2x32xf32>
      tpu.vector_store %arg20[%c0_111, %c0_112], %50 {strides = array<i32>} : memref<2x32xf32, #tpu.memory_space<vmem>>, vector<2x32xf32>,
      %c0_113 = arith.constant 0 : index
      %c0_114 = arith.constant 0 : index
      %337 = vector.load %arg21[%c0_113, %c0_114] : memref<2x32xf32, #tpu.memory_space<vmem>>, vector<2x32xf32>
      tpu.vector_store %arg21[%c0_113, %c0_114], %48 {strides = array<i32>} : memref<2x32xf32, #tpu.memory_space<vmem>>, vector<2x32xf32>,
      %c0_115 = arith.constant 0 : index
      %c0_116 = arith.constant 0 : index
      %c0_117 = arith.constant 0 : index
      %338 = vector.load %arg22[%c0_115, %c0_116, %c0_117] : memref<2x8x16xf32, #tpu.memory_space<vmem>>, vector<2x8x16xf32>
      tpu.vector_store %arg22[%c0_115, %c0_116, %c0_117], %312 {strides = array<i32>} : memref<2x8x16xf32, #tpu.memory_space<vmem>>, vector<2x8x16xf32>,
    } else {
    }
    return
  }
  func.func @transform_0(%arg0: i32) -> (i32, i32, i32) {
    %c0_i32 = arith.constant 0 : i32
    %c0_i32_0 = arith.constant 0 : i32
    %c0_i32_1 = arith.constant 0 : i32
    return %arg0, %c0_i32, %c0_i32_0 : i32, i32, i32
  }
  func.func @transform_1(%arg0: i32) -> (i32, i32) {
    %c0_i32 = arith.constant 0 : i32
    %c0_i32_0 = arith.constant 0 : i32
    %c0_i32_1 = arith.constant 0 : i32
    return %c0_i32, %c0_i32_0 : i32, i32
  }
  func.func @transform_2(%arg0: i32) -> (i32, i32) {
    %c0_i32 = arith.constant 0 : i32
    %c0_i32_0 = arith.constant 0 : i32
    %c0_i32_1 = arith.constant 0 : i32
    return %c0_i32, %c0_i32_0 : i32, i32
  }
  func.func @transform_3(%arg0: i32) -> (i32, i32) {
    %c0_i32 = arith.constant 0 : i32
    %c0_i32_0 = arith.constant 0 : i32
    %c0_i32_1 = arith.constant 0 : i32
    return %c0_i32, %c0_i32_0 : i32, i32
  }
  func.func @transform_4(%arg0: i32) -> (i32, i32) {
    %c0_i32 = arith.constant 0 : i32
    %c0_i32_0 = arith.constant 0 : i32
    %c0_i32_1 = arith.constant 0 : i32
    return %c0_i32, %c0_i32_0 : i32, i32
  }
  func.func @transform_5(%arg0: i32) -> (i32, i32) {
    %c0_i32 = arith.constant 0 : i32
    %c0_i32_0 = arith.constant 0 : i32
    %c0_i32_1 = arith.constant 0 : i32
    return %c0_i32, %c0_i32_0 : i32, i32
  }
  func.func @transform_6(%arg0: i32) -> (i32, i32, i32) {
    %c0_i32 = arith.constant 0 : i32
    %c0_i32_0 = arith.constant 0 : i32
    %c0_i32_1 = arith.constant 0 : i32
    %c0_i32_2 = arith.constant 0 : i32
    return %c0_i32, %c0_i32_0, %c0_i32_1 : i32, i32, i32
  }
  func.func @transform_7(%arg0: i32) -> (i32, i32) {
    %c0_i32 = arith.constant 0 : i32
    %c0_i32_0 = arith.constant 0 : i32
    %c0_i32_1 = arith.constant 0 : i32
    return %c0_i32, %c0_i32_0 : i32, i32
  }
  func.func @transform_8(%arg0: i32) -> (i32, i32) {
    %c0_i32 = arith.constant 0 : i32
    %c0_i32_0 = arith.constant 0 : i32
    %c0_i32_1 = arith.constant 0 : i32
    return %c0_i32, %c0_i32_0 : i32, i32
  }
  func.func @transform_9(%arg0: i32) -> (i32, i32) {
    %c0_i32 = arith.constant 0 : i32
    %c0_i32_0 = arith.constant 0 : i32
    %c0_i32_1 = arith.constant 0 : i32
    return %c0_i32, %c0_i32_0 : i32, i32
  }
  func.func @transform_10(%arg0: i32) -> (i32, i32) {
    %c0_i32 = arith.constant 0 : i32
    %c0_i32_0 = arith.constant 0 : i32
    %c0_i32_1 = arith.constant 0 : i32
    return %c0_i32, %c0_i32_0 : i32, i32
  }
  func.func @transform_11(%arg0: i32) -> (i32, i32) {
    %c0_i32 = arith.constant 0 : i32
    %c0_i32_0 = arith.constant 0 : i32
    %c0_i32_1 = arith.constant 0 : i32
    return %c0_i32, %c0_i32_0 : i32, i32
  }
  func.func @transform_12(%arg0: i32) -> (i32, i32) {
    %c0_i32 = arith.constant 0 : i32
    %c0_i32_0 = arith.constant 0 : i32
    %c0_i32_1 = arith.constant 0 : i32
    return %c0_i32, %c0_i32_0 : i32, i32
  }
  func.func @transform_13(%arg0: i32) -> (i32, i32) {
    %c0_i32 = arith.constant 0 : i32
    %c0_i32_0 = arith.constant 0 : i32
    %c0_i32_1 = arith.constant 0 : i32
    return %c0_i32, %c0_i32_0 : i32, i32
  }
  func.func @transform_14(%arg0: i32) -> (i32, i32) {
    %c0_i32 = arith.constant 0 : i32
    %c0_i32_0 = arith.constant 0 : i32
    %c0_i32_1 = arith.constant 0 : i32
    return %c0_i32, %c0_i32_0 : i32, i32
  }
  func.func @transform_15(%arg0: i32) -> (i32, i32, i32) {
    %c0_i32 = arith.constant 0 : i32
    %c0_i32_0 = arith.constant 0 : i32
    %c0_i32_1 = arith.constant 0 : i32
    return %arg0, %c0_i32, %c0_i32_0 : i32, i32, i32
  }
  func.func @transform_16(%arg0: i32) -> (i32, i32) {
    %c0_i32 = arith.constant 0 : i32
    %c0_i32_0 = arith.constant 0 : i32
    %c0_i32_1 = arith.constant 0 : i32
    return %c0_i32, %c0_i32_0 : i32, i32
  }
  func.func @transform_17(%arg0: i32) -> (i32, i32) {
    %c0_i32 = arith.constant 0 : i32
    %c0_i32_0 = arith.constant 0 : i32
    %c0_i32_1 = arith.constant 0 : i32
    return %c0_i32, %c0_i32_0 : i32, i32
  }
  func.func @transform_18(%arg0: i32) -> (i32, i32) {
    %c0_i32 = arith.constant 0 : i32
    %c0_i32_0 = arith.constant 0 : i32
    %c0_i32_1 = arith.constant 0 : i32
    return %c0_i32, %c0_i32_0 : i32, i32
  }
  func.func @transform_19(%arg0: i32) -> (i32, i32) {
    %c0_i32 = arith.constant 0 : i32
    %c0_i32_0 = arith.constant 0 : i32
    %c0_i32_1 = arith.constant 0 : i32
    return %c0_i32, %c0_i32_0 : i32, i32
  }
  func.func @transform_20(%arg0: i32) -> (i32, i32) {
    %c0_i32 = arith.constant 0 : i32
    %c0_i32_0 = arith.constant 0 : i32
    %c0_i32_1 = arith.constant 0 : i32
    return %c0_i32, %c0_i32_0 : i32, i32
  }
  func.func @transform_21(%arg0: i32) -> (i32, i32, i32) {
    %c0_i32 = arith.constant 0 : i32
    %c0_i32_0 = arith.constant 0 : i32
    %c0_i32_1 = arith.constant 0 : i32
    %c0_i32_2 = arith.constant 0 : i32
    return %c0_i32, %c0_i32_0, %c0_i32_1 : i32, i32, i32
  }
}

</mosaic_0001>

<bundles_post_ra>
// kernel: tpu_custom_call.1
= control target key start
LH: loop header
LB: loop body
LE: loop exit
PB: predicated region body
PF: predicated region fallthrough
CT: control target
= control target key end

     0   :  { %s3958_s0 = inlined_call_operand.hbm [shape: f32[6,2,8], index: 0, kind: input, shape index: {}]   ;;  %s3959_s1 = inlined_call_operand.vmem [shape: f32[2,16], index: 1, kind: input, shape index: {}]   ;;  %s3960_s2 = inlined_call_operand.hbm [shape: f32[2,8], index: 2, kind: input, shape index: {}]   ;;  %s3961_s3 = inlined_call_operand.hbm [shape: f32[2,8], index: 3, kind: input, shape index: {}]   ;;  %s3962_s4 = inlined_call_operand.hbm [shape: f32[2,32], index: 4, kind: input, shape index: {}]   ;;  %s3963_s5 = inlined_call_operand.hbm [shape: f32[2,32], index: 5, kind: input, shape index: {}]   ;;  %s3964_s6 = inlined_call_operand.vmem [shape: f32[2,8,16], index: 6, kind: input, shape index: {}]   ;;  %s3965_s7 = inlined_call_operand.hbm [shape: f32[8,128], index: 7, kind: input, shape index: {}]   ;;  %s3966_s8 = inlined_call_operand.hbm [shape: f32[16,128], index: 8, kind: input, shape index: {}]   ;;  %s3967_s9 = inlined_call_operand.vmem [shape: f32[32,128], index: 9, kind: input, shape index: {}]   ;;  %s3968_s10 = inlined_call_operand.hbm [shape: f32[1,128], index: 10, kind: input, shape index: {}]   ;;  %s3969_s11 = inlined_call_operand.hbm [shape: f32[32,77], index: 11, kind: input, shape index: {}]   ;;  %s3970_s12 = inlined_call_operand.vmem [shape: f32[1,77], index: 12, kind: input, shape index: {}]   ;;  %s3971_s13 = inlined_call_operand.vmem [shape: f32[8,16], index: 13, kind: input, shape index: {}]   ;;  %s3972_s14 = inlined_call_operand.vmem [shape: f32[16,1], index: 14, kind: input, shape index: {}]   ;;  %s3973_s15 = inlined_call_operand.vmem [shape: f32[6,2,1], index: 15, kind: output, shape index: {0}]   ;;  %s3974_s16 = inlined_call_operand.hbm [shape: f32[2,16], index: 16, kind: output, shape index: {1}]   ;;  %s3975_s17 = inlined_call_operand.hbm [shape: f32[2,8], index: 17, kind: output, shape index: {2}]   ;;  %s3976_s18 = inlined_call_operand.hbm [shape: f32[2,8], index: 18, kind: output, shape index: {3}]   ;;  %s3977_s19 = inlined_call_operand.hbm [shape: f32[2,32], index: 19, kind: output, shape index: {4}]   ;;  %s3978_s20 = inlined_call_operand.hbm [shape: f32[2,32], index: 20, kind: output, shape index: {5}]   ;;  %s3979_s21 = inlined_call_operand.hbm [shape: f32[2,8,16], index: 21, kind: output, shape index: {6}]  }
   0x1   :  { %3995 = sst [smem:[#allocation41_spill]] %s3958_s0 }
   0x2   :  { %3996 = sst [smem:[#allocation42_spill]] %s3959_s1 }
   0x3   :  { %3997 = sst [smem:[#allocation43_spill]] %s3960_s2 }
   0x4   :  { %3998 = sst [smem:[#allocation44_spill]] %s3961_s3 }
   0x5   :  { %3999 = sst [smem:[#allocation45_spill]] %s3962_s4 }
   0x6   :  { %4000 = sst [smem:[#allocation46_spill]] %s3963_s5 }
   0x7   :  { %4001 = sst [smem:[#allocation47_spill]] %s3964_s6 }
   0x8   :  { %4002 = sst [smem:[#allocation48_spill]] %s3965_s7 }
   0x9   :  { %4003 = sst [smem:[#allocation49_spill]] %s3968_s10 }
   0xa   :  { %4004 = sst [smem:[#allocation50_spill]] %s3971_s13 }
   0xb   :  { %4005 = sst [smem:[#allocation51_spill]] %s3972_s14 }
   0xc   :  { %4006 = sst [smem:[#allocation52_spill]] %s3974_s16 }
   0xd   :  { %4007 = sst [smem:[#allocation53_spill]] %s3975_s17 }
   0xe   :  { %4008 = sst [smem:[#allocation54_spill]] %s3976_s18 }
   0xf   :  { %4009 = sst [smem:[#allocation55_spill]] %s3977_s19 }
  0x10   :  { %4010 = sst [smem:[#allocation56_spill]] %s3978_s20 }
  0x11   :  { %4011 = sst [smem:[#allocation57_spill]] %s3979_s21 }
  0x12   :  { %27 = vsyncpa [#allocation9], 0 }
  0x13   :  { %29 = vsyncpa [#allocation9 + $0x1], 0 }
  0x14   :  { %30 = vsyncpa [#allocation12], 0 }
  0x15   :  { %31 = vsyncpa [#allocation15], 0 }
  0x16   :  { %32 = vsyncpa [#allocation18], 0 }
  0x17   :  { %33 = vsyncpa [#allocation21], 0 }
  0x18   :  { %34 = vsyncpa [#allocation10], 0 }
  0x19   :  { %35 = vsyncpa [#allocation25], 0 }
  0x1a   :  { %36 = vsyncpa [#allocation28], 0 }
  0x1b   :  { %37 = vsyncpa [#allocation31], 0  ;;  %s3251_s2 = smov 0   ;;  %s3253_s25 = smov 0  }
  0x1c   :  { %s3255_s26 = smov 0   ;;  %s3257_s27 = smov 0  }
  0x1d LB: > { %s3094_s3 = smov [#allocation11]   ;;  %s3272_s29 = sadd.s32 4294967295, %s3092_s27   ;;  %s3092_s27 = sphi %s3257_s27, %s4049_s27   ;;  %s3088_s26 = sphi %s3255_s26, %s4048_s26   ;;  %s3084_s25 = sphi %s3253_s25, %s4047_s25   ;;  %s3080_s2 = sphi %s3251_s2, %s4046_s2  }
  0x1e   : > { %s536_s28 = sshll.u32 %s3094_s3, 4  ;;  %p2199_p0 = scmp.ge.s32.totalorder %s3092_s27, 1  ;;  %s3278_s28 = int_to_ptr.vmem [resolvable:$true] %s536_s28 }
  0x1f   : > { %p3992_p1 = scmp.eq.s32.totalorder %s3272_s29, 0  ;;  %p520_p2 = scmp.lt.s32.totalorder %s3092_s27, 7 }
  0x20   : > { %s3095_s4 = smov [#allocation14]   ;;  %s3096_s5 = smov [#allocation17]  }
  0x21   : > { %p3280_p4 = pnand %p2199_p0, %p520_p2  ;;  %s558_s30 = sshll.u32 %s3095_s4, 4  ;;  %s3286_s30 = int_to_ptr.vmem [resolvable:$true] %s558_s30 }
  0x22   : > { %s583_s22 = sshll.u32 %s3096_s5, 4  ;;  %s3097_s1 = smov [#allocation20]   ;;  %s3294_s22 = int_to_ptr.vmem [resolvable:$true] %s583_s22 }
  0x23   : > { %s4012_s0 = scalar_select %p3280_p4, 1, 0 }
  0x24   : > { %p2399_p5 = pneg %p3280_p4  ;;  %s3296_s24 = sshll.u32 %s3097_s1, 4  ;;  %s611_s24 = int_to_ptr.vmem [resolvable:$true] %s3296_s24 }
  0x25   : > { %s4014_s20 = sld [smem:[#allocation43_spill]] }
  0x26   : > { %p3290_p6 = pnand %p2399_p5, %p3992_p1 }
  0x28   : > { %p3306_p8 = pneg %p3290_p6 }
  0x2b   : > { %s2616_s18 = scalar_lea.hbm %s4014_s20, 32 }
  0x2c   : > { %p2617_p7 = scmp.ne.s32.totalorder %s4014_s20, %s2616_s18  ;;  %p2623_p11 = scmp.lt.u32.totalorder %s2616_s18, %s4014_s20 }
  0x2e   : > { %p2619_p9 = pnand %p3306_p8, %p2617_p7 }
  0x30   : > { %p2620_p10 = pneg %p2619_p9 }
  0x32   : > { %p2625_p12 = pnand %p2623_p11, %p2620_p10 }
  0x34   : > { %2628 = shalt.err (!%p2625_p12)
}
  0x35   : > { %s2629_s16 = scalar_lea.vmem %s3278_s28, 32  ;;  %p2637_p5 = scmp.lt.s32.totalorder %s3278_s28, %s3278_s28 }
  0x36   : > { %p2630_p13 = scmp.ne.s32.totalorder %s3278_s28, %s2629_s16  ;;  %p2638_p3 = scmp.lt.s32.totalorder %s2629_s16, %s2629_s16 }
  0x38   : > { %p2632_p0 = pnand %p2630_p13, %p3306_p8  ;;  %p2639_p7 = por %p2638_p3, %p2637_p5 }
  0x3a   : > { %p2633_p2 = pneg %p2632_p0 }
  0x3c   : > { %p2640_p9 = pnand %p2639_p7, %p2633_p2 }
  0x3e   : > { %2643 = shalt.err (!%p2640_p9)
}
  0x3f   : > { %2402 = dma.hbm_to_vmem [thread:$0]  (!%p3290_p6), %s4014_s20, 32, %s3278_s28, [#allocation12]  }
  0x40   : > { %s4016_s4 = sld [smem:[#allocation45_spill]] }
  0x46   : > { %s2644_s1 = scalar_lea.hbm %s4016_s4, 32 }
  0x47   : > { %p2645_p10 = scmp.ne.s32.totalorder %s4016_s4, %s2644_s1  ;;  %p2651_p12 = scmp.lt.u32.totalorder %s2644_s1, %s4016_s4 }
  0x49   : > { %p2647_p3 = pnand %p2645_p10, %p3306_p8 }
  0x4b   : > { %p2648_p11 = pneg %p2647_p3 }
  0x4d   : > { %p2653_p13 = pnand %p2651_p12, %p2648_p11 }
  0x4f   : > { %2656 = shalt.err (!%p2653_p13)
}
  0x50   : > { %s2657_s28 = scalar_lea.vmem %s3286_s30, 32  ;;  %p2665_p7 = scmp.lt.s32.totalorder %s3286_s30, %s3286_s30 }
  0x51   : > { %p2658_p0 = scmp.ne.s32.totalorder %s3286_s30, %s2657_s28  ;;  %p2666_p9 = scmp.lt.s32.totalorder %s2657_s28, %s2657_s28 }
  0x53   : > { %p2660_p2 = pnand %p2658_p0, %p3306_p8  ;;  %p2667_p10 = por %p2666_p9, %p2665_p7 }
  0x55   : > { %p2661_p5 = pneg %p2660_p2 }
  0x57   : > { %p2668_p3 = pnand %p2667_p10, %p2661_p5 }
  0x59   : > { %2671 = shalt.err (!%p2668_p3)
}
  0x5a   : > { %2408 = dma.hbm_to_vmem [thread:$0]  (!%p3290_p6), %s4016_s4, 32, %s3286_s30, [#allocation15]  }
  0x5b   : > { %s4017_s7 = sld [smem:[#allocation48_spill]] }
  0x61   : > { %s2672_s19 = scalar_lea.hbm %s4017_s7, 128 }
  0x62   : > { %p2673_p11 = scmp.ne.s32.totalorder %s4017_s7, %s2672_s19  ;;  %p2679_p0 = scmp.lt.u32.totalorder %s2672_s19, %s4017_s7 }
  0x64   : > { %p2675_p12 = pnand %p2673_p11, %p3306_p8 }
  0x66   : > { %p2676_p13 = pneg %p2675_p12 }
  0x68   : > { %p2681_p2 = pnand %p2679_p0, %p2676_p13 }
  0x6a   : > { %2684 = shalt.err (!%p2681_p2)
}
  0x6b   : > { %s2685_s30 = scalar_lea.vmem %s3294_s22, 128  ;;  %p2693_p10 = scmp.lt.s32.totalorder %s3294_s22, %s3294_s22 }
  0x6c   : > { %p2686_p5 = scmp.ne.s32.totalorder %s3294_s22, %s2685_s30  ;;  %p2694_p3 = scmp.lt.s32.totalorder %s2685_s30, %s2685_s30 }
  0x6e   : > { %p2688_p7 = pnand %p2686_p5, %p3306_p8  ;;  %p2695_p11 = por %p2694_p3, %p2693_p10 }
  0x70   : > { %p2689_p9 = pneg %p2688_p7 }
  0x72   : > { %p2696_p12 = pnand %p2695_p11, %p2689_p9 }
  0x74   : > { %2699 = shalt.err (!%p2696_p12)
}
  0x75   : > { %2414 = dma.hbm_to_vmem [thread:$0]  (!%p3290_p6), %s4017_s7, 128, %s3294_s22, [#allocation18]  }
  0x76   : > { %s3098_s14 = smov [#allocation13]   ;;  %s4018_s10 = sld [smem:[#allocation49_spill]] }
  0x77   : > { %s547_s17 = sshll.u32 %s3098_s14, 4  ;;  %s548_s17 = int_to_ptr.vmem [resolvable:$true] %s547_s17 }
  0x7c   : > { %s2700_s21 = scalar_lea.hbm %s4018_s10, 16 }
  0x7d   : > { %p2701_p13 = scmp.ne.s32.totalorder %s4018_s10, %s2700_s21  ;;  %p2707_p5 = scmp.lt.u32.totalorder %s2700_s21, %s4018_s10 }
  0x7f   : > { %p2703_p0 = pnand %p2701_p13, %p3306_p8 }
  0x81   : > { %p2704_p2 = pneg %p2703_p0 }
  0x83   : > { %p2709_p7 = pnand %p2707_p5, %p2704_p2 }
  0x85   : > { %2712 = shalt.err (!%p2709_p7)
}
  0x86   : > { %s2713_s22 = scalar_lea.vmem %s611_s24, 16  ;;  %s2720_s28 = scalar_lea.vmem %s611_s24, 32 }
  0x87   : > { %p2714_p9 = scmp.ne.s32.totalorder %s611_s24, %s2713_s22  ;;  %p2721_p11 = scmp.lt.s32.totalorder %s611_s24, %s611_s24 }
  0x88   : > { %p2722_p12 = scmp.lt.s32.totalorder %s2720_s28, %s2713_s22 }
  0x89   : > { %p2716_p10 = pnand %p2714_p9, %p3306_p8 }
  0x8a   : > { %p2723_p1 = por %p2722_p12, %p2721_p11 }
  0x8b   : > { %p2717_p3 = pneg %p2716_p10 }
  0x8d   : > { %p2724_p4 = pnand %p2723_p1, %p2717_p3 }
  0x8f   : > { %2727 = shalt.err (!%p2724_p4)
}
  0x90   : > { %2420 = dma.hbm_to_vmem [thread:$0]  (!%p3290_p6), %s4018_s10, 16, %s611_s24, [#allocation21]  }
  0x91   : > { %s4019_s21 = sld [smem:[#allocation44_spill]] }
  0x97   : > { %s2728_s3 = scalar_lea.hbm %s4019_s21, 32 }
  0x98   : > { %p2729_p13 = scmp.ne.s32.totalorder %s4019_s21, %s2728_s3  ;;  %p2735_p4 = scmp.lt.u32.totalorder %s2728_s3, %s4019_s21 }
  0x9a   : > { %p2731_p0 = pnand %p2729_p13, %p3306_p8 }
  0x9c   : > { %p2732_p1 = pneg %p2731_p0 }
  0x9e   : > { %p2737_p2 = pnand %p2735_p4, %p2732_p1 }
  0xa0   : > { %2740 = shalt.err (!%p2737_p2)
}
  0xa1   : > { %s2741_s28 = scalar_lea.vmem %s548_s17, 32  ;;  %p2749_p10 = scmp.lt.s32.totalorder %s548_s17, %s548_s17 }
  0xa2   : > { %p2742_p5 = scmp.ne.s32.totalorder %s548_s17, %s2741_s28  ;;  %p2750_p3 = scmp.lt.s32.totalorder %s2741_s28, %s2741_s28 }
  0xa4   : > { %p2744_p7 = pnand %p2742_p5, %p3306_p8  ;;  %p2751_p11 = por %p2750_p3, %p2749_p10 }
  0xa6   : > { %p2745_p9 = pneg %p2744_p7 }
  0xa8   : > { %p2752_p12 = pnand %p2751_p11, %p2745_p9 }
  0xaa   : > { %2755 = shalt.err (!%p2752_p12)
}
  0xab   : > { %2405 = dma.hbm_to_vmem [thread:$0]  (!%p3290_p6), %s4019_s21, 32, %s548_s17, [#allocation12]  }
  0xac   : > { %s3099_s14 = smov [#allocation16]   ;;  %s3100_s19 = smov [#allocation19]  }
  0xad   : > { %s569_s18 = sshll.u32 %s3099_s14, 4  ;;  %s593_s3 = sshll.u32 %s3100_s19, 4  ;;  %s570_s18 = int_to_ptr.vmem [resolvable:$true] %s569_s18  ;;  %s594_s3 = int_to_ptr.vmem [resolvable:$true] %s593_s3 }
  0xae   : > { %s4020_s30 = sld [smem:[#allocation46_spill]] }
  0xb4   : > { %s2756_s22 = scalar_lea.hbm %s4020_s30, 32 }
  0xb5   : > { %p2757_p13 = scmp.ne.s32.totalorder %s4020_s30, %s2756_s22  ;;  %p2763_p4 = scmp.lt.u32.totalorder %s2756_s22, %s4020_s30 }
  0xb7   : > { %p2759_p0 = pnand %p2757_p13, %p3306_p8 }
  0xb9   : > { %p2760_p1 = pneg %p2759_p0 }
  0xbb   : > { %p2765_p2 = pnand %p2763_p4, %p2760_p1 }
  0xbd   : > { %2768 = shalt.err (!%p2765_p2)
}
  0xbe   : > { %s2769_s17 = scalar_lea.vmem %s570_s18, 32  ;;  %p2777_p10 = scmp.lt.s32.totalorder %s570_s18, %s570_s18 }
  0xbf   : > { %p2770_p5 = scmp.ne.s32.totalorder %s570_s18, %s2769_s17  ;;  %p2778_p3 = scmp.lt.s32.totalorder %s2769_s17, %s2769_s17 }
  0xc1   : > { %p2772_p7 = pnand %p2770_p5, %p3306_p8  ;;  %p2779_p11 = por %p2778_p3, %p2777_p10 }
  0xc3   : > { %p2773_p9 = pneg %p2772_p7 }
  0xc5   : > { %p2780_p12 = pnand %p2779_p11, %p2773_p9 }
  0xc7   : > { %2783 = shalt.err (!%p2780_p12)
}
  0xc8   : > { %2411 = dma.hbm_to_vmem [thread:$0]  (!%p3290_p6), %s4020_s30, 32, %s570_s18, [#allocation15]  }
  0xc9   : > { %s2784_s19 = scalar_lea.hbm %s3966_s8, 256 }
  0xca   : > { %p2785_p13 = scmp.ne.s32.totalorder %s3966_s8, %s2784_s19  ;;  %p2791_p4 = scmp.lt.u32.totalorder %s2784_s19, %s3966_s8 }
  0xcc   : > { %p2787_p0 = pnand %p2785_p13, %p3306_p8 }
  0xce   : > { %p2788_p1 = pneg %p2787_p0 }
  0xd0   : > { %p2793_p2 = pnand %p2791_p4, %p2788_p1 }
  0xd2   : > { %2796 = shalt.err (!%p2793_p2)
}
  0xd3   : > { %s2797_s24 = scalar_lea.vmem %s594_s3, 256  ;;  %p2805_p10 = scmp.lt.s32.totalorder %s594_s3, %s594_s3 }
  0xd4   : > { %p2798_p5 = scmp.ne.s32.totalorder %s594_s3, %s2797_s24  ;;  %p2806_p3 = scmp.lt.s32.totalorder %s2797_s24, %s2797_s24 }
  0xd6   : > { %p2800_p7 = pnand %p2798_p5, %p3306_p8  ;;  %p2807_p11 = por %p2806_p3, %p2805_p10 }
  0xd8   : > { %p2801_p9 = pneg %p2800_p7 }
  0xda   : > { %p2808_p12 = pnand %p2807_p11, %p2801_p9 }
  0xdc   : > { %2811 = shalt.err (!%p2808_p12)
}
  0xdd   : > { %s3101_s18 = smov 128   ;;  %s3102_s17 = smov 8  }
  0xde   : > { %2417 = dma.hbm_to_vmem [thread:$0]  (!%p3290_p6), %s3966_s8, 256, %s594_s3, [#allocation18], %s3101_s18, %s3101_s18, %s3102_s17  }
  0xdf   : > { %s3103_s7 = smov [#allocation22]   ;;  %s2812_s16 = scalar_lea.hbm %s3969_s11, 512 }
  0xe0   : > { %s620_s14 = sshll.u32 %s3103_s7, 4  ;;  %p2813_p13 = scmp.ne.s32.totalorder %s3969_s11, %s2812_s16  ;;  %s621_s14 = int_to_ptr.vmem [resolvable:$true] %s620_s14 }
  0xe1   : > { %p2819_p4 = scmp.lt.u32.totalorder %s2812_s16, %s3969_s11 }
  0xe2   : > { %p2815_p0 = pnand %p2813_p13, %p3306_p8 }
  0xe4   : > { %p2816_p1 = pneg %p2815_p0 }
  0xe6   : > { %p2821_p2 = pnand %p2819_p4, %p2816_p1 }
  0xe8   : > { %2824 = shalt.err (!%p2821_p2)
}
  0xe9   : > { %s2825_s3 = scalar_lea.vmem %s621_s14, 512  ;;  %p2833_p10 = scmp.lt.s32.totalorder %s621_s14, %s621_s14 }
  0xea   : > { %p2826_p5 = scmp.ne.s32.totalorder %s621_s14, %s2825_s3  ;;  %p2834_p3 = scmp.lt.s32.totalorder %s2825_s3, %s2825_s3 }
  0xec   : > { %p2828_p7 = pnand %p2826_p5, %p3306_p8  ;;  %p2835_p11 = por %p2834_p3, %p2833_p10 }
  0xee   : > { %p2829_p9 = pneg %p2828_p7 }
  0xf0   : > { %p2836_p12 = pnand %p2835_p11, %p2829_p9 }
  0xf2   : > { %2839 = shalt.err (!%p2836_p12)
}
  0xf3   : > { %2423 = dma.hbm_to_vmem [thread:$0]  (!%p3290_p6), %s3969_s11, 512, %s621_s14, [#allocation21], %s3101_s18, %s3101_s18, %s3102_s17  }
  0xf4   : > { %s3465_s10 = sadd.s32 1, %s3092_s27   ;;  %s50_s23 = sadd.s32 1, %s3088_s26 }
  0xf5   : > { %s47_s5 = ssub.s32 %s3092_s27, %s3465_s10  ;;  %p57_p8 = scmp.ne.s32.totalorder %s3088_s26, %s3084_s25 }
  0xf6   : > { %p48_p13 = scmp.eq.s32.totalorder %s47_s5, 0  ;;  %p58_p0 = scmp.eq.s32.totalorder %s3092_s27, 0 }
  0xf7   : > { %p63_p1 = scmp.ne.s32.totalorder %s3084_s25, %s3080_s2  ;;  %p2436_p4 = scmp.lt.s32.totalorder %s3092_s27, 6 }
  0xf8   : > { %s3477_s7 = scalar_select %p48_p13, %s3088_s26, %s50_s23  }
  0xf9   : > { %p59_p2 = por %p58_p0, %p57_p8  ;;  %p4021_p5 = scmp.eq.s32.totalorder %s3272_s29, 0 }
  0xfa   : > { %s643_s1 = sand.u32 1, %s3088_s26   ;;  %s2210_s18 = sshll.u32 %s3092_s27, 5 }
  0xfb   : > { %p3481_p7 = por %p4021_p5, %p63_p1  ;;  %s2209_s17 = sshll.u32 %s643_s1, 1 }
  0xfc   : > { %s4023_s22 = sld [smem:[#allocation41_spill]]  ;;  %s647_s2 = scalar_lea.vmem [#allocation8], %s2209_s17 }
  0xfd   : > { %s654_s24 = sshll.u32 %s647_s2, 4  ;;  %p3492_p6 = pnand %p2436_p4, %p59_p2  ;;  %s3496_s24 = int_to_ptr.vmem [resolvable:$true] %s654_s24 }
  0xfe   : > { %s644_s27 = scalar_lea.sflag [#allocation9], %s643_s1 }
  0xff   : > { %p2842_p10 = pneg %p3492_p6 }
 0x102   : > { %s3490_s28 = scalar_lea.hbm %s4023_s22, %s2210_s18  ;;  %s2845_s5 = scalar_lea.hbm %s4023_s22, 192 }
 0x103   : > { %s2840_s4 = scalar_lea.hbm %s3490_s28, 32  ;;  %p2846_p12 = scmp.lt.u32.totalorder %s3490_s28, %s4023_s22 }
 0x104   : > { %p2841_p9 = scmp.ne.s32.totalorder %s3490_s28, %s2840_s4  ;;  %p2847_p8 = scmp.lt.u32.totalorder %s2845_s5, %s2840_s4 }
 0x105   : > { %p2849_p0 = scmp.lt.u32.totalorder %s2840_s4, %s3490_s28 }
 0x106   : > { %p2843_p3 = pnand %p2842_p10, %p2841_p9  ;;  %p2848_p13 = por %p2847_p8, %p2846_p12 }
 0x108   : > { %p2844_p11 = pneg %p2843_p3  ;;  %p2850_p1 = por %p2849_p0, %p2848_p13 }
 0x10a   : > { %p2851_p4 = pnand %p2850_p1, %p2844_p11 }
 0x10c   : > { %2854 = shalt.err (!%p2851_p4)
}
 0x10d   : > { %s2855_s1 = scalar_lea.vmem %s3496_s24, 32  ;;  %s3104_s14 = smov [#allocation8]  }
 0x10e   : > { %p2856_p2 = scmp.ne.s32.totalorder %s3496_s24, %s2855_s1  ;;  %s2860_s16 = sshll.u32 %s3104_s14, 4  ;;  %s2861_s16 = int_to_ptr.vmem [resolvable:$false] %s2860_s16 }
 0x10f   : > { %s2862_s2 = scalar_lea.vmem %s2861_s16, 64  ;;  %p2863_p3 = scmp.lt.s32.totalorder %s3496_s24, %s2861_s16 }
 0x110   : > { %p2858_p5 = pnand %p2856_p2, %p2842_p10  ;;  %p2864_p12 = scmp.lt.s32.totalorder %s2862_s2, %s2855_s1 }
 0x112   : > { %p2859_p9 = pneg %p2858_p5  ;;  %p2865_p8 = por %p2864_p12, %p2863_p3 }
 0x114   : > { %p2866_p13 = pnand %p2865_p8, %p2859_p9 }
 0x116   : > { %2869 = shalt.err (!%p2866_p13)
}
 0x117   : > { %2427 = dma.hbm_to_vmem [thread:$0]  (!%p3492_p6), %s3490_s28, 32, %s3496_s24, %s644_s27  }
 0x118   : > { %p4025_p11 = scmp.ne.s32.totalorder %s4012_s0, 0 }
 0x119   : > { %s665_s4 = sand.u32 (!%p4025_p11), 1, %s3084_s25  }
 0x11a   : > { %663 = sbr.rel (%p4025_p11) target bundleno = 3446 (0xd76), region = 80  ;;  %s3526_s13 = sshll.u32 (!%p4025_p11), %s665_s4, 1 }
 0x11b   : > { %s666_s23 = scalar_lea.sflag (!%p4025_p11), [#allocation9], %s665_s4  ;;  %s669_s5 = scalar_lea.vmem (!%p4025_p11), [#allocation8], %s3526_s13 }
 0x121   : > { %3043 = dma.done.wait (%p3481_p7), %s666_s23, 32  }
 0x122   : > { %3045 = vsyncadd (%p3481_p7), %s666_s23, 4294967264  ;;  %p4026_p10 = scmp.eq.s32.totalorder %s3272_s29, 0 }
 0x124   : > { %3047 = dma.done.wait (%p4026_p10), [#allocation12], 64   ;;  %p4027_p6 = pmov %p4026_p10 }
 0x126   : > { %3049 = vsyncadd (%p4027_p6), [#allocation12], 4294967232  ;;  %p4028_p0 = pmov %p4027_p6 }
 0x128   : > { %3051 = dma.done.wait (%p4028_p0), [#allocation15], 64   ;;  %p4029_p1 = pmov %p4028_p0 }
 0x129   : > { %p4030_p4 = pmov %p4028_p0 }
 0x12a   : > { %3053 = vsyncadd (%p4029_p1), [#allocation15], 4294967232 }
 0x12b   : > { %3055 = dma.done.wait (%p4030_p4), [#allocation18], 384   ;;  %p4031_p2 = pmov %p4028_p0 }
 0x12c   : > { %p4032_p7 = pmov %p4028_p0 }
 0x12d   : > { %3057 = vsyncadd (%p4031_p2), [#allocation18], 4294966912 }
 0x12e   : > { %3059 = dma.done.wait (%p4032_p7), [#allocation21], 528   ;;  %p4033_p5 = pmov %p4028_p0 }
 0x12f   : > { %p759_p9 = scmp.lt.s32.totalorder %s3272_s29, 5  ;;  %p4034_p3 = scmp.ne.s32.totalorder %s3272_s29, 0 }
 0x130   : > { %3061 = vsyncadd (%p4033_p5), [#allocation21], 4294966768  ;;  %s4035_s17 = sld [smem:[#allocation42_spill]] (!%p4034_p3)  ;;  %vm768_vm0 = vcmask (!%p4034_p3), 123904   ;;  %v770_v1 = vld [vmem:[#allocation11] sm:$0x3] (!%p4034_p3) }
 0x131   : > { %s760_s0 = scalar_select %p759_p9, %s3272_s29, 5 }
 0x132   : > { %766 = sbr.rel (%p4034_p3) target bundleno = 315 (0x13b), region = 120  ;;  %vm771_vm1 = vcmask (!%p4034_p3), 58368   ;;  %v773_v2 = vld [vmem:[#allocation13] sm:$0x3] (!%p4034_p3)  ;;  %v775_v3 = vld [vmem:[#allocation14] sm:$0x3] (!%p4034_p3) }
 0x133   : > { %s2221_s19 = sshll.u32 %s760_s0, 1  ;;  %772 = vst.msk [vmem:[#allocation3] sm:$0x3] (!%p4034_p3), %vm771_vm1, %v770_v1  ;;  %vm776_vm2 = vcmask (!%p4034_p3), 254976   ;;  %s4036_s6 = sld [smem:[#allocation47_spill]] (!%p4034_p3)  ;;  %vm782_vm3 = vcmask (!%p4034_p3), 130048  }
 0x134   : > { %s3554_s3 = scalar_lea.vmem %s3973_s15, %s2221_s19  ;;  %774 = vst.msk [vmem:[#allocation4] sm:$0x3] (!%p4034_p3), %vm771_vm1, %v773_v2  ;;  %v778_v5 = vld [vmem:[#allocation16] sm:$0x3] (!%p4034_p3) }
 0x135   : > { %777 = vst.msk [vmem:[#allocation5] sm:$0x3] (!%p4034_p3), %vm776_vm2, %v775_v3  ;;  %779 = vst.msk [vmem:[#allocation6] sm:$0x3] (!%p4034_p3), %vm776_vm2, %v778_v5 }
 0x136   : > { %v767_v0 = vld [vmem:[%s4035_s17] sm:$0x3] (!%p4034_p3) }
 0x137   : > { %769 = vst.msk [vmem:[#allocation2] sm:$0x3] (!%p4034_p3), %vm768_vm0, %v767_v0 }
 0x139   : > { %v780_v4 = vld [vmem:[%s4036_s6] sm:$0xff]  ;;  %v781_v6 = vld [vmem:[%s4036_s6 + $0x8] sm:$0xff] }
 0x13a   : > { %783 = vst.msk [vmem:[#allocation7] sm:$0xff] %vm782_vm3, %v780_v4  ;;  %784 = vst.msk [vmem:[#allocation7 + $0x8] sm:$0xff] %vm782_vm3, %v781_v6 }
 0x13b PF: > { %v793_v7 = vld [vmem:[#allocation17] sm:$0xff]  ;;  %v794_v8 = vld [vmem:[#allocation19] sm:$0xff]  ;;  %v795_v9 = vld [vmem:[#allocation19 + $0x8] sm:$0xff]  ;;  %v3105_v10 = vmov 0.0   ;;  %v3106_v11 = vmov 0.0|0.0   ;;  %vm883_vm4 = vcmask 64512   ;;  %v1221_v0 = vlaneseq }
 0x13c   : > { %2279 = vmatprep.subr.mxu1 %v3105_v10  ;;  %2323 = vmatprep.subr.bf16.mxu0 %v3106_v11  ;;  %v2324_v12 = vpack.c.bf16 %v795_v9, %v794_v8  ;;  %v785_v13 = vld [vmem:[%s669_s5] sm:$0x3]  ;;  %v796_v14 = vld [vmem:[%s3967_s9] sm:$0xff]  ;;  %v797_v15 = vld [vmem:[%s3967_s9 + $0x8] sm:$0xff]  ;;  %vm3107_vm5 = vmmov 0   ;;  %vm809_vm6 = vcmask 130048  }
 0x13d   : > { %2280 = vmatpush3.msra.mxu1 %v793_v7  ;;  %2281 = vmatprep.mubr.msk.f32.mxu1 %vm3107_vm5, %v3105_v10  ;;  %v2327_v16 = vpack.c.bf16 %v797_v15, %v796_v14  ;;  %v798_v17 = vld [vmem:[%s3967_s9 + $0x10] sm:$0xff]  ;;  %v799_v18 = vld [vmem:[%s3967_s9 + $0x18] sm:$0xff]  ;;  %vm957_vm7 = vcmask 261120   ;;  %s3108_s27 = smov 64   ;;  %s3109_s18 = smov 32   ;;  %v801_v44 = vld [vmem:[#allocation22] sm:$0xff] }
 0x13e   : > { %2325 = vmatpush3.bf16.msra.mxu0 %v2324_v12  ;;  %2282 = vmatmul.mubr.msk.f32.vlgmr.msra.gmra.mrb[0].mxu1 %vm883_vm4, %v785_v13  ;;  %v2330_v20 = vpack.c.bf16 %v799_v18, %v798_v17  ;;  %v789_v21 = vld [vmem:[#allocation5] sm:$0x3]  ;;  %v2226_v27 = vld [vmem:[#allocation20] ss:$0 sm:$0xff]  ;;  %v790_v33 = vld [vmem:[#allocation6] sm:$0x3] }
 0x13f   : > { %2326 = vmatprep.subr.bf16.mxu1 %v3106_v11  ;;  %2276 = vmatprep.mubr.msk.f32.mxu0 %vm3107_vm5, %v3105_v10  ;;  %v802_v45 = vld [vmem:[#allocation22 + $0x8] sm:$0xff]  ;;  %v803_v46 = vld [vmem:[#allocation22 + $0x10] sm:$0xff]  ;;  %v804_v48 = vld [vmem:[#allocation22 + $0x18] sm:$0xff]  ;;  %vm1903_vm8 = vcmask 254976   ;;  %v3110_v62 = vmov 1966171168  }
 0x140   : > { %v786_v19 = vld [vmem:[#allocation2] sm:$0x3]  ;;  %2328 = vmatpush3.bf16.msra.mxu1 %v2327_v16  ;;  %2292 = vmatprep.mubr.msk.f32.mxu1 %vm3107_vm5, %v3105_v10  ;;  %v2333_v47 = vpack.c.bf16 %v802_v45, %v801_v44  ;;  %v2336_v49 = vpack.c.bf16 %v804_v48, %v803_v46  ;;  %v1219_v63 = vunpack.c.l.s4 %v3110_v62  ;;  %v3633_v3 = vshrl.u32 %v1221_v0, 7  ;;  %s3113_s14 = smov 106   ;;  %s3115_s16 = smov 110  }
 0x141   : > { %2277 = vmatmul.mubr.msk.f32.vlgmr.msra.gmra.mrb[0].mxu0 %vm809_vm6, %v786_v19  ;;  %2329 = vmatprep.subr.bf16.mxu1 %v3106_v11  ;;  %v3605_v53 = vld [vmem:[#allocation7] sm:$0xff]  ;;  %v3610_v55 = vld [vmem:[#allocation7 + $0x8] sm:$0xff]  ;;  %v2228_v1 = vld [vmem:[%s3970_s12] ss:$0 sm:$0xff]  ;;  %vm1259_vm9 = vcmask 123904   ;;  %vm1311_vm2 = vcmask 1041409  }
 0x142   : > { %2332 = vmatprep.subr.bf16.mxu0 %v3106_v11  ;;  %2303 = vmatprep.mubr.msk.f32.mxu0 %vm3107_vm5, %v3105_v10  ;;  %v3608_v54 = vadd.f32 1e-16, %v3605_v53  ;;  %v3615_v57 = vadd.f32 1e-16, %v3610_v55  ;;  %v1220_v2 = vunpack.c.0.s8 %v1219_v63  ;;  %v3648_v15 = vsub.s32 0, %v3633_v3  ;;  %s4037_s23 = sld [smem:[#allocation50_spill]] }
 0x143   : > { %2334 = vmatpush3.bf16.msra.mxu0 %v2333_v47  ;;  %v3667_v46 = vsub.s32 1, %v3633_v3  ;;  %vm1315_vm3 = vcmask 58368   ;;  %s3122_s0 = smov 120   ;;  %s3123_s19 = smov 88  }
 0x144   : > { %2331 = vmatpush3.bf16.msra.mxu1 %v2330_v20  ;;  %2335 = vmatprep.subr.bf16.mxu0 %v3106_v11  ;;  %v1150_v56 = vmul.f32 %v3608_v54, %v3608_v54  ;;  %v1151_v59 = vmul.f32 %v3615_v57, %v3615_v57  ;;  %v3639_v8 = vsub.s32 %v1220_v2, %v3633_v3  ;;  %s4038_s13 = sld [smem:[#allocation51_spill]]  ;;  %s3129_s17 = smov 84  }
 0x145   : > { %2306 = vmatprep.subr.mxu1 %v3105_v10  ;;  %s3130_s1 = smov 68   ;;  %p2235_p12 = scmp.ne.s32.totalorder %s3272_s29, 5 }
 0x146   : > { %v1152_v58 = vsel %vm809_vm6, %v1150_v56, 0.0  ;;  %v1155_v60 = vsel %vm809_vm6, %v1151_v59, 0.0 }
 0x147   : > { %2293 = vmatmul.mubr.msk.f32.vlgmr.msra.gmra.mrb[2].mxu1 %vm957_vm7, %v789_v21  ;;  %2337 = vmatpush3.bf16.msra.mxu0 %v2336_v49 }
 0x148   : > { %2308 = vmatprep.mubr.msk.f32.mxu1 %vm3107_vm5, %v3105_v10  ;;  %2311 = vmatprep.subr.mxu0 %v3105_v10 }
 0x211   : > { %v953_v22 = vpop.f32.mrb[0].mxu1 }
 0x212   : > { %v2283_v23 = vpop.f32.mrb[1].mxu1 }
 0x214   : > { %v879_v24 = vpop.f32.mrb[0].mxu0 }
 0x215   : > { %v954_v25 = vadd.f32 %v953_v22, %v879_v24  ;;  %v2278_v26 = vpop.f32.mrb[1].mxu0  ;;  %v3111_v24 = vmov 0  }
 0x216   : > { %2536 = vset.pattern.permute.xlu0 %v3111_v24  ;;  %2535 = vset.pattern.permute.xlu1 %v3111_v24 }
 0x21a   : > { %v1027_v28 = vpop.f32.mrb[2].mxu1 }
 0x21b   : > { %v1031_v29 = vadd.f32 %v1027_v28, %v954_v25  ;;  %v2294_v30 = vpop.f32.mrb[3].mxu1 }
 0x21d   : > { %v1038_v31 = vadd.f32 %v2226_v27, %v1031_v29 }
 0x21f   : > { %2552 = vtanh.f32 %v1038_v31  ;;  %v2227_v34 = vmul.f32 -1.442695, %v1038_v31 }
 0x221   : > { %2554 = vpow2.f32 %v2227_v34 }
 0x229   : > { %v2553_v32 = vpop.eup %2552 }
 0x22a   : > { %1052 = vrot.lane.b32.xlu0 %v2553_v32, %s3108_s27 }
 0x22b   : > { %v2555_v35 = vpop.eup %2554 }
 0x22c   : > { %v1042_v36 = vadd.f32 1.0, %v2555_v35 }
 0x22e   : > { %1047 = vrot.lane.b32.xlu0 %v790_v33, %s3109_s18  ;;  %2556 = vrcp.f32 %v1042_v36 }
 0x238   : > { %v2557_v37 = vpop.eup %2556 }
 0x29c   : > { %v1053_v38 = vpop.permute.xlu0 %1052 }
 0x29d   : > { %v1055_v39 = vmul.f32 %v2557_v37, %v1053_v38 }
 0x29f   : > { %1057 = vrot.lane.b32.xlu1 %v1055_v39, %s3109_s18 }
 0x2a0   : > { %v1048_v40 = vpop.permute.xlu0 %1047 }
 0x2a1   : > { %v1050_v41 = vmul.f32 %v2557_v37, %v1048_v40 }
 0x311   : > { %v1058_v42 = vpop.permute.xlu1 %1057 }
 0x312   : > { %v3600_v43 = vadd.f32 %v1058_v42, %v1050_v41 }
 0x314   : > { %2558 = vtanh.f32 %v3600_v43 }
 0x31e   : > { %v2559_v50 = vpop.eup %2558 }
 0x31f   : > { %1063 = vrot.lane.b32.xlu1 %v2559_v50, %s3108_s27 }
 0x391   : > { %v1064_v51 = vpop.permute.xlu1 %1063 }
 0x392   : > { %v1066_v52 = vmul.f32 %v2557_v37, %v1064_v51 }
 0x394   : > { %1074 = vrot.lane.b32.xlu0 %v1066_v52, %s3109_s18  ;;  %s3128_s18 = smov 76  }
 0x3b3   : > { %1153 = vadd.xlane.f32.xlu0 %v1152_v58 }
 0x3b7   : > { %1156 = vadd.xlane.f32.xlu0 %v1155_v60 }
 0x406   : > { %v3621_v61 = vpop.permute.xlu0 %1074 }
 0x407   : > { %1904 = vst.msk [vmem:[#allocation5] sm:$0x3] %vm1903_vm8, %v3621_v61  ;;  %2304 = vmatmul.mubr.msk.f32.vlgmr.msra.gmra.mrb[2].mxu0 %vm957_vm7, %v3621_v61  ;;  %vm1198_vm7 = vcmask 165008   ;;  %1919 = vst.msk [vmem:[#allocation27] sm:$0x3] (!%p2235_p12), %vm1903_vm8, %v3621_v61 }
 0x408   : > { %2313 = vmatprep.mubr.msk.f32.mxu0 %vm3107_vm5, %v3105_v10 }
 0x440   : > { %v1154_v25 = vpop.xlane.xlu0 %1153 }
 0x441   : > { %2560 = vrsqrt.f32 %v1154_v25  ;;  %vm1160_vm10 = vcmp.eq.f32.partialorder %v1154_v25, inf  ;;  %vm1162_vm12 = vcmp.eq.f32.partialorder %v1154_v25, 0.0  ;;  %v1163_v37 = vand.u32 2147483648, %v1154_v25 }
 0x444   : > { %v1157_v28 = vpop.xlane.xlu0 %1156 }
 0x445   : > { %2562 = vrsqrt.f32 %v1157_v28  ;;  %vm1167_vm11 = vcmp.eq.f32.partialorder %v1157_v28, inf  ;;  %v1170_v38 = vand.u32 2147483648, %v1157_v28  ;;  %vm1169_vm13 = vcmp.eq.f32.partialorder %v1157_v28, 0.0 }
 0x44b   : > { %v2561_v31 = vpop.eup %2560 }
 0x44c   : > { %v1159_v34 = vmul.f32 %v2561_v31, %v1154_v25 }
 0x44e   : > { %v1161_v40 = vsel %vm1160_vm10, %v1154_v25, %v1159_v34 }
 0x44f   : > { %v2563_v32 = vpop.eup %2562  ;;  %v3669_v47 = vsel %vm1162_vm12, %v1163_v37, %v1161_v40  ;;  %vm1209_vm12 = vcmask 17408  }
 0x450   : > { %v1166_v35 = vmul.f32 %v2563_v32, %v1157_v28  ;;  %v1172_v52 = vmax.f32 %v3669_v47, 1e-08 }
 0x452   : > { %v1168_v41 = vsel %vm1167_vm11, %v1157_v28, %v1166_v35 }
 0x453   : > { %v3671_v48 = vsel %vm1169_vm13, %v1170_v38, %v1168_v41 }
 0x454   : > { %v1173_v56 = vmax.f32 %v3671_v48, 1e-08 }
 0x4da   : > { %v1144_v4 = vpop.f32.mrb[2].mxu0 }
 0x4db   : > { %v3635_v5 = vadd.f32 %v2228_v1, %v1144_v4  ;;  %v2305_v6 = vpop.f32.mrb[3].mxu0 }
 0x4dd   : > { %v1216_v7 = vadd.f32 1e-16, %v3635_v5  ;;  %v1177_v26 = vand.u32 2147483647, %v3635_v5  ;;  %vm1175_vm1 = vcmp.ne.f32.partialorder %v3635_v5, %v3635_v5 }
 0x4df   : > { %v3641_v9 = vmul.f32 %v1216_v7, %v1216_v7  ;;  %v1224_v12 = vrot.slane %v1216_v7, %v3639_v8  ;;  %v1178_v27 = vsub.f32 0.0, %v1177_v26  ;;  %v3114_v26 = vmov 17  }
 0x4e1   : > { %v1260_v13 = vsel %vm1259_vm9, %v3641_v9, 0.0  ;;  %v1232_v14 = vrot.slane %v1224_v12, %v3639_v8  ;;  %v1225_v16 = vcombine.high %v1224_v12, %v1224_v12  ;;  %v1179_v29 = vmul.f32 1.442695, %v1178_v27 }
 0x4e2   : > { %1261 = vadd.xlane.f32.xlu1 %v1260_v13  ;;  %v1302_v27 = vand.u32 127, %v1221_v0 }
 0x4e3   : > { %v3651_v17 = vrot.slane %v1232_v14, %v3648_v15  ;;  %v1239_v18 = vrot.slane %v1225_v16, %v3639_v8  ;;  %2564 = vpow2.f32 %v1179_v29 }
 0x4e4   : > { %v3691_v28 = vsub.s32 %v1302_v27, %v3633_v3  ;;  %v1199_v3 = vsel %vm1198_vm7, %v3635_v5, -inf }
 0x4e5   : > { %v1250_v19 = vmul.f32 %v3651_v17, %v3608_v54  ;;  %v3657_v20 = vrot.slane %v1239_v18, %v3648_v15 }
 0x4e7   : > { %v1252_v21 = vsel %vm809_vm6, %v1250_v19, 0.0  ;;  %v1251_v22 = vmul.f32 %v3657_v20, %v3615_v57  ;;  %v1174_v19 = vmax.f32 %v3635_v5, 0.0 }
 0x4e8   : > { %1253 = vadd.xlane.f32.xlu1 %v1252_v21 }
 0x4e9   : > { %v1255_v23 = vsel %vm809_vm6, %v1251_v22, 0.0 }
 0x4ea   : > { %1256 = vadd.xlane.f32.xlu0 %v1255_v23  ;;  %v3112_v23 = vmov 16  }
 0x4ed   : > { %v2565_v33 = vpop.eup %2564 }
 0x4ee   : > { %v1181_v39 = vadd.f32 1.0, %v2565_v33  ;;  %v1184_v62 = vmul.f32 -0.5, %v2565_v33  ;;  %v1187_v2 = vand.u32 2147483647, %v2565_v33 }
 0x4f0   : > { %v1185_v1 = vadd.f32 1.0, %v1184_v62  ;;  %vm1188_vm0 = vcmp.lt.f32.partialorder %v1187_v2, 0.0004427343 }
 0x4f2   : > { %v1186_v6 = vmul.f32 %v2565_v33, %v1185_v1  ;;  %v2230_v33 = vmul.f32 -1.442695, %v3635_v5 }
 0x56f   : > { %v1262_v30 = vpop.xlane.xlu1 %1261 }
 0x570   : > { %2566 = vrsqrt.f32 %v1262_v30  ;;  %vm1265_vm14 = vcmp.eq.f32.partialorder %v1262_v30, inf  ;;  %v1268_v44 = vand.u32 2147483648, %v1262_v30  ;;  %vm1267_vm15 = vcmp.eq.f32.partialorder %v1262_v30, 0.0 }
 0x571   : > { %2568 = vlog2.f32 %v1181_v39 }
 0x575   : > { %v1254_v12 = vpop.xlane.xlu1 %1253 }
 0x577   : > { %v1257_v18 = vpop.xlane.xlu0 %1256 }
 0x57a   : > { %v2567_v36 = vpop.eup %2566 }
 0x57b   : > { %v1264_v42 = vmul.f32 %v2567_v36, %v1262_v30  ;;  %v2569_v63 = vpop.eup %2568 }
 0x57c   : > { %v1183_v4 = vmul.f32 0.6931472, %v2569_v63 }
 0x57d   : > { %v1266_v45 = vsel %vm1265_vm14, %v1262_v30, %v1264_v42 }
 0x57e   : > { %v1269_v49 = vsel %vm1267_vm15, %v1268_v44, %v1266_v45  ;;  %v1189_v13 = vsel %vm1188_vm0, %v1186_v6, %v1183_v4 }
 0x57f   : > { %v1270_v50 = vmax.f32 %v1269_v49, 1e-08  ;;  %v1190_v22 = vadd.f32 %v1189_v13, %v1174_v19 }
 0x581   : > { %v1275_v51 = vrot.slane %v1270_v50, %v3648_v15  ;;  %v1279_v58 = vrot.slane %v1270_v50, %v3667_v46  ;;  %v3685_v25 = vsel %vm1175_vm1, %v3635_v5, %v1190_v22 }
 0x583   : > { %v1282_v59 = vmul.f32 %v1275_v51, %v1172_v52  ;;  %v1283_v60 = vmul.f32 %v1279_v58, %v1173_v56 }
 0x585   : > { %2570 = vrcp.f32 %v1282_v59 }
 0x586   : > { %2572 = vrcp.f32 %v1283_v60 }
 0x587   : > { %2574 = vpow2.f32 %v2230_v33 }
 0x58f   : > { %v2571_v7 = vpop.eup %2570 }
 0x590   : > { %v2573_v14 = vpop.eup %2572  ;;  %v1285_v16 = vmul.f32 %v2571_v7, %v1254_v12 }
 0x591   : > { %v1287_v21 = vmul.f32 %v2573_v14, %v1257_v18  ;;  %v2575_v36 = vpop.eup %2574 }
 0x592   : > { %1296 = vperm.xlu1 %2535, %v1285_v16   ;;  %v1195_v37 = vadd.f32 1.0, %v2575_v36  ;;  %v3118_v36 = vmov 18  }
 0x593   : > { %1299 = vperm.xlu0 %2536, %v1287_v21  }
 0x594   : > { %2576 = vrcp.f32 %v1195_v37 }
 0x596   : > { %2537 = vset.pattern.permute.xlu1 %v3112_v23 }
 0x597   : > { %1484 = vrot.lane.b32.xlu0 %v3641_v9, %s3113_s14  ;;  %1290 = vperm.xlu1 %2537, %v3685_v25  }
 0x598   : > { %2538 = vset.pattern.permute.xlu0 %v3114_v26 }
 0x59b   : > { %2539 = vset.pattern.permute.xlu1 %v3114_v26  ;;  %v787_v26 = vld [vmem:[#allocation3] sm:$0x3] }
 0x59e   : > { %v3700_v38 = vpop.eup %2576 }
 0x59f   : > { %v1333_v39 = vsub.f32 1.0, %v3700_v38 }
 0x611   : > { %v1297_v29 = vpop.permute.xlu1 %1296 }
 0x612   : > { %v1306_v30 = vrot.slane %v1297_v29, %v3691_v28  ;;  %v1300_v31 = vpop.permute.xlu0 %1299 }
 0x613   : > { %v1310_v32 = vrot.slane %v1300_v31, %v3691_v28 }
 0x615   : > { %v1312_v34 = vsel %vm1311_vm2, %v1310_v32, %v1306_v30 }
 0x616   : > { %v1291_v9 = vpop.permute.xlu1 %1290  ;;  %v1485_v40 = vpop.permute.xlu0 %1484 }
 0x617   : > { %v1314_v35 = vmul.f32 %v1312_v34, %v1291_v9  ;;  %v1487_v41 = vsel %vm1259_vm9, %v1485_v40, 0.0 }
 0x619   : > { %v1316_v0 = vsel %vm1315_vm3, %v1314_v35, -inf }
 0x61a   : > { %1317 = vmax.xlane.f32.xlu1 %v1316_v0 }
 0x61e   : > { %1200 = vmax.xlane.f32.xlu1 %v1199_v3 }
 0x62f   : > { %1469 = vrot.lane.b32.xlu1 %v3651_v17, %s3113_s14 }
 0x633   : > { %1471 = vrot.lane.b32.xlu1 %v3657_v20, %s3113_s14  ;;  %s3131_s14 = smov 52  }
 0x637   : > { %1336 = vperm.xlu1 %2539, %v1333_v39  }
 0x63b   : > { %2540 = vset.pattern.permute.xlu1 %v3111_v24 }
 0x65b   : > { %1488 = vadd.xlane.f32.xlu1 %v1487_v41 }
 0x6a7   : > { %v1318_v42 = vpop.xlane.xlu1 %1317 }
 0x6a8   : > { %v1319_v44 = vsub.f32 %v1314_v35, %v1318_v42  ;;  %v3116_v35 = vmov 38  }
 0x6aa   : > { %v1320_v45 = vmul.f32 1.442695, %v1319_v44 }
 0x6ab   : > { %v1201_v49 = vpop.xlane.xlu1 %1200 }
 0x6ac   : > { %2578 = vpow2.f32 %v1320_v45  ;;  %v1202_v20 = vsub.f32 %v3635_v5, %v1201_v49 }
 0x6ae   : > { %v1203_v58 = vmul.f32 1.442695, %v1202_v20 }
 0x6af   : > { %v1470_v17 = vpop.permute.xlu1 %1469 }
 0x6b0   : > { %v1475_v50 = vmul.f32 %v1470_v17, %v3608_v54  ;;  %2580 = vpow2.f32 %v1203_v58  ;;  %v806_v54 = vld [vmem:[%s4037_s23] sm:$0xff]  ;;  %v3119_v58 = vmov 19  }
 0x6b1   : > { %2307 = vmatpush3.msra.mxu1 %v806_v54  ;;  %2312 = vmatpush3.msra.mxu0 %v806_v54  ;;  %v3740_v54 = vadd.f32 1.0, %v3685_v25 }
 0x6b2   : > { %v1477_v51 = vsel %vm809_vm6, %v1475_v50, 0.0  ;;  %2338 = vmatprep.subr.bf16.mxu1 %v3106_v11 }
 0x6b3   : > { %1478 = vadd.xlane.f32.xlu1 %v1477_v51  ;;  %v1472_v62 = vpop.permute.xlu1 %1471 }
 0x6b4   : > { %v1476_v63 = vmul.f32 %v1472_v62, %v3615_v57 }
 0x6b6   : > { %v2579_v59 = vpop.eup %2578  ;;  %v1480_v1 = vsel %vm809_vm6, %v1476_v63, 0.0 }
 0x6b7   : > { %v1322_v24 = vsel %vm1315_vm3, %v2579_v59, 0.0  ;;  %v1337_v2 = vpop.permute.xlu1 %1336 }
 0x6b8   : > { %1323 = vadd.xlane.f32.xlu0 %v1322_v24  ;;  %v1339_v30 = vmul.f32 %v1337_v2, %v787_v26  ;;  %v3121_v24 = vmov 39  }
 0x6ba   : > { %v3712_v60 = vpop.eup %2580 }
 0x6c4   : > { %1206 = vrot.lane.b32.xlu1 %v3712_v60, %s3115_s16  ;;  %s3132_s16 = smov 96  }
 0x6ce   : > { %1329 = vperm.xlu0 %2538, %v3700_v38  }
 0x6e8   : > { %v1489_v4 = vpop.xlane.xlu1 %1488 }
 0x6e9   : > { %2582 = vrsqrt.f32 %v1489_v4  ;;  %vm1492_vm10 = vcmp.eq.f32.partialorder %v1489_v4, inf  ;;  %v1495_v13 = vand.u32 2147483648, %v1489_v4  ;;  %vm1494_vm11 = vcmp.eq.f32.partialorder %v1489_v4, 0.0 }
 0x6ed   : > { %1481 = vadd.xlane.f32.xlu0 %v1480_v1 }
 0x6f3   : > { %v2583_v6 = vpop.eup %2582 }
 0x6f4   : > { %v1491_v7 = vmul.f32 %v2583_v6, %v1489_v4 }
 0x6f6   : > { %v1493_v12 = vsel %vm1492_vm10, %v1489_v4, %v1491_v7 }
 0x6f7   : > { %v1496_v14 = vsel %vm1494_vm11, %v1495_v13, %v1493_v12 }
 0x6f8   : > { %v1497_v16 = vmax.f32 %v1496_v14, 1e-08 }
 0x6fa   : > { %v1502_v18 = vrot.slane %v1497_v16, %v3648_v15  ;;  %v1506_v47 = vrot.slane %v1497_v16, %v3667_v46 }
 0x6fc   : > { %v1509_v11 = vmul.f32 %v1502_v18, %v1172_v52  ;;  %v1510_v52 = vmul.f32 %v1506_v47, %v1173_v56 }
 0x6fe   : > { %2584 = vrcp.f32 %v1509_v11 }
 0x708   : > { %v2585_v57 = vpop.eup %2584 }
 0x740   : > { %v1479_v19 = vpop.xlane.xlu1 %1478 }
 0x741   : > { %v1512_v21 = vmul.f32 %v2585_v57, %v1479_v19 }
 0x743   : > { %1522 = vperm.xlu1 %2540, %v1512_v21  }
 0x744   : > { %v1207_v0 = vpop.permute.xlu1 %1206 }
 0x745   : > { %v1324_v22 = vpop.xlane.xlu0 %1323  ;;  %v1210_v3 = vsel %vm1209_vm12, %v1207_v0, 0.0 }
 0x746   : > { %2586 = vrcp.f32 %v1324_v22 }
 0x747   : > { %2588 = vrcp.f32 %v1510_v52 }
 0x74d   : > { %v1330_v29 = vpop.permute.xlu0 %1329 }
 0x750   : > { %v2587_v23 = vpop.eup %2586 }
 0x751   : > { %v1326_v27 = vmul.f32 %v2587_v23, %v2579_v59  ;;  %v2589_v33 = vpop.eup %2588 }
 0x753   : > { %v1332_v31 = vmul.f32 %v1330_v29, %v1326_v27 }
 0x755   : > { %v1340_v32 = vadd.f32 %v1339_v30, %v1332_v31 }
 0x757   : > { %2309 = vmatmul.mubr.msk.f32.vlgmr.msra.gmra.mrb[4].mxu1 %vm883_vm4, %v1340_v32 }
 0x758   : > { %2320 = vmatprep.mubr.msk.f32.mxu1 %vm3107_vm5, %v3105_v10  ;;  %v3117_v10 = vmov 20   ;;  %vm1453_vm5 = vcmask 345408  }
 0x759   : > { %2542 = vset.pattern.permute.xlu0 %v3117_v10  ;;  %v1454_v59 = vsel %vm1453_vm5, %v3635_v5, -inf }
 0x77a   : > { %v1482_v9 = vpop.xlane.xlu0 %1481 }
 0x77b   : > { %v1514_v34 = vmul.f32 %v2589_v33, %v1482_v9 }
 0x77d   : > { %1525 = vperm.xlu1 %2540, %v1514_v34   ;;  %v788_v34 = vld [vmem:[#allocation4] sm:$0x3] }
 0x781   : > { %2541 = vset.pattern.permute.xlu1 %v3116_v35 }
 0x782   : > { %1516 = vperm.xlu1 %2541, %v3685_v25  }
 0x786   : > { %2543 = vset.pattern.permute.xlu1 %v3118_v36 }
 0x7a6   : > { %1211 = vadd.xlane.f32.xlu1 %v1210_v3 }
 0x7c2   : > { %v1523_v48 = vpop.permute.xlu1 %1522 }
 0x7c3   : > { %v1530_v40 = vrot.slane %v1523_v48, %v3691_v28  ;;  %v3124_v48 = vmov 42  }
 0x7fc   : > { %v1526_v56 = vpop.permute.xlu1 %1525 }
 0x7fd   : > { %v1534_v37 = vrot.slane %v1526_v56, %v3691_v28  ;;  %v3120_v28 = vmov 21   ;;  %v3125_v56 = vmov 40  }
 0x7ff   : > { %v1535_v41 = vsel %vm1311_vm2, %v1534_v37, %v1530_v40 }
 0x801   : > { %v1517_v42 = vpop.permute.xlu1 %1516 }
 0x802   : > { %v1537_v44 = vmul.f32 %v1535_v41, %v1517_v42 }
 0x804   : > { %v1538_v45 = vsel %vm1315_vm3, %v1537_v44, -inf }
 0x805   : > { %1539 = vmax.xlane.f32.xlu0 %v1538_v45 }
 0x82a   : > { %v1410_v49 = vpop.f32.mrb[4].mxu1 }
 0x82b   : > { %v2310_v17 = vpop.f32.mrb[5].mxu1 }
 0x82c   : > { %v808_v17 = vld [vmem:[%s4038_s13 + $0x8] sm:$0xff] }
 0x833   : > { %v1212_v50 = vpop.xlane.xlu1 %1211 }
 0x834   : > { %2590 = vrcp.f32 %v1212_v50 }
 0x83e   : > { %v2591_v20 = vpop.eup %2590 }
 0x83f   : > { %v1214_v51 = vmul.f32 %v2591_v20, %v3712_v60 }
 0x841   : > { %1416 = vperm.xlu1 %2543, %v1214_v51   ;;  %1427 = vperm.xlu0 %2542, %v1214_v51  }
 0x845   : > { %2544 = vset.pattern.permute.xlu0 %v3119_v58  ;;  %2546 = vset.pattern.permute.xlu1 %v3121_v24 }
 0x846   : > { %1421 = vperm.xlu0 %2544, %v1214_v51  }
 0x84a   : > { %2545 = vset.pattern.permute.xlu0 %v3120_v28  ;;  %v3126_v28 = vmov 41  }
 0x865   : > { %1455 = vmax.xlane.f32.xlu0 %v1454_v59  ;;  %v3127_v59 = vmov 43  }
 0x87b   : > { %1441 = vperm.xlu0 %2545, %v3740_v54  }
 0x87f   : > { %2547 = vset.pattern.permute.xlu0 %v3124_v48 }
 0x892   : > { %v1540_v62 = vpop.xlane.xlu0 %1539 }
 0x893   : > { %v1541_v12 = vsub.f32 %v1537_v44, %v1540_v62 }
 0x895   : > { %v1542_v13 = vmul.f32 1.442695, %v1541_v12 }
 0x897   : > { %2592 = vpow2.f32 %v1542_v13 }
 0x8a1   : > { %v2593_v14 = vpop.eup %2592 }
 0x8a2   : > { %v1544_v25 = vsel %vm1315_vm3, %v2593_v14, 0.0 }
 0x8c0   : > { %v1428_v60 = vpop.permute.xlu0 %1427  ;;  %v1417_v1 = vpop.permute.xlu1 %1416 }
 0x8c1   : > { %v1430_v63 = vmul.f32 %v1428_v60, %v1410_v49  ;;  %v1419_v4 = vmul.f32 %v1417_v1, %v1410_v49  ;;  %v807_v49 = vld [vmem:[%s4038_s13] sm:$0xff] }
 0x8c2   : > { %v2339_v50 = vpack.c.bf16 %v808_v17, %v807_v49 }
 0x8c3   : > { %1432 = vrot.lane.b32.xlu1 %v1430_v63, %s3122_s0 }
 0x8c4   : > { %2340 = vmatpush3.bf16.msra.mxu1 %v2339_v50 }
 0x8c5   : > { %v1422_v2 = vpop.permute.xlu0 %1421 }
 0x8c6   : > { %v1424_v6 = vmul.f32 %v1422_v2, %v1340_v32 }
 0x8c8   : > { %v1425_v7 = vadd.f32 %v1424_v6, %v1419_v4 }
 0x8e7   : > { %1545 = vadd.xlane.f32.xlu1 %v1544_v25 }
 0x8f2   : > { %v1456_v16 = vpop.xlane.xlu0 %1455 }
 0x8f3   : > { %v1457_v18 = vsub.f32 %v3635_v5, %v1456_v16 }
 0x8f5   : > { %v1458_v11 = vmul.f32 1.442695, %v1457_v18 }
 0x8f7   : > { %2594 = vpow2.f32 %v1458_v11 }
 0x8f8   : > { %1550 = vperm.xlu1 %2546, %v3700_v38  }
 0x8fa   : > { %v1442_v27 = vpop.permute.xlu0 %1441 }
 0x8fc   : > { %1555 = vperm.xlu1 %2546, %v1333_v39  }
 0x900   : > { %2548 = vset.pattern.permute.xlu1 %v3125_v56 }
 0x901   : > { %v2595_v57 = vpop.eup %2594 }
 0x902   : > { %1461 = vrot.lane.b32.xlu0 %v2595_v57, %s3123_s19 }
 0x935   : > { %v1433_v19 = vpop.permute.xlu1 %1432 }
 0x936   : > { %v1435_v21 = vadd.f32 %v1433_v19, %v1425_v7 }
 0x938   : > { %v1436_v22 = vadd.f32 1e-16, %v1435_v21 }
 0x93a   : > { %2596 = vlog2.f32 %v1436_v22 }
 0x944   : > { %v2597_v23 = vpop.eup %2596 }
 0x945   : > { %v1438_v26 = vmul.f32 0.6931472, %v2597_v23 }
 0x947   : > { %v1444_v29 = vmul.f32 %v1442_v27, %v1438_v26 }
 0x949   : > { %v1445_v30 = vmul.f32 1.442695, %v1444_v29 }
 0x94b   : > { %2598 = vpow2.f32 %v1445_v30 }
 0x955   : > { %v2599_v31 = vpop.eup %2598 }
 0x956   : > { %v1447_v32 = vsel %vm1315_vm3, %v2599_v31, 0.0 }
 0x957   : > { %1448 = vadd.xlane.f32.xlu1 %v1447_v32 }
 0x974   : > { %v1462_v47 = vpop.permute.xlu0 %1461  ;;  %v1546_v52 = vpop.xlane.xlu1 %1545 }
 0x975   : > { %2600 = vrcp.f32 %v1546_v52  ;;  %v1464_v39 = vsel %vm1209_vm12, %v1462_v47, 0.0 }
 0x976   : > { %1465 = vadd.xlane.f32.xlu0 %v1464_v39 }
 0x978   : > { %v1551_v33 = vpop.permute.xlu1 %1550 }
 0x97c   : > { %v1556_v35 = vpop.permute.xlu1 %1555 }
 0x97d   : > { %v1558_v10 = vmul.f32 %v1556_v35, %v788_v34 }
 0x97f   : > { %v2601_v9 = vpop.eup %2600 }
 0x980   : > { %v1548_v0 = vmul.f32 %v2601_v9, %v2593_v14 }
 0x982   : > { %v1553_v3 = vmul.f32 %v1551_v33, %v1548_v0 }
 0x984   : > { %v1559_v36 = vadd.f32 %v1558_v10, %v1553_v3 }
 0x986   : > { %2314 = vmatmul.mubr.msk.f32.vlgmr.msra.gmra.mrb[4].mxu0 %vm883_vm4, %v1559_v36  ;;  %vm1896_vm4 = vcmask 1024  }
 0x9e4   : > { %v1449_v37 = vpop.xlane.xlu1 %1448 }
 0x9e5   : > { %v1450_v40 = vadd.f32 1e-16, %v1449_v37 }
 0x9e7   : > { %2602 = vrcp.f32 %v1450_v40 }
 0x9f1   : > { %v2603_v41 = vpop.eup %2602 }
 0x9f2   : > { %v3752_v42 = vmul.f32 %v2603_v41, %v2599_v31 }
 0x9f4   : > { %v1674_v44 = vrot.slane %v3752_v42, %v3648_v15  ;;  %1900 = vst.msk [vmem:[#allocation3] sm:$0x3] %vm1315_vm3, %v3752_v42  ;;  %v1681_v45 = vrot.slane %v3752_v42, %v3667_v46  ;;  %1917 = vst.msk [vmem:[#allocation24] sm:$0x3] (!%p2235_p12), %vm1315_vm3, %v3752_v42 }
 0x9f6   : > { %1676 = vbcast.lane.b32.xlu1 %v1674_v44, 256 }
 0x9fa   : > { %1683 = vbcast.lane.b32.xlu1 %v1681_v45, 256 }
 0xa03   : > { %v1466_v20 = vpop.xlane.xlu0 %1465 }
 0xa04   : > { %2604 = vrcp.f32 %v1466_v20  ;;  %v1721_v20 = vrot.slane %v3700_v38, %v3639_v8 }
 0xa0e   : > { %v2605_v51 = vpop.eup %2604 }
 0xa0f   : > { %v1468_v58 = vmul.f32 %v2605_v51, %v2595_v57  ;;  %v1729_v51 = vrot.slane %v1721_v20, %v3639_v8 }
 0xa11   : > { %1646 = vperm.xlu0 %2547, %v1468_v58   ;;  %1635 = vperm.xlu1 %2548, %v1468_v58  }
 0xa15   : > { %2549 = vset.pattern.permute.xlu1 %v3126_v28  ;;  %2551 = vset.pattern.permute.xlu0 %v3127_v59  ;;  %v1740_v28 = vrot.slane %v1729_v51, %v3648_v15 }
 0xa16   : > { %1640 = vperm.xlu1 %2549, %v1468_v58   ;;  %v1722_v58 = vcombine.high %v1721_v20, %v1721_v20 }
 0xa1a   : > { %2550 = vset.pattern.permute.xlu1 %v3127_v59  ;;  %v1736_v59 = vrot.slane %v1722_v58, %v3639_v8 }
 0xa59   : > { %v1629_v24 = vpop.f32.mrb[4].mxu0 }
 0xa5a   : > { %v2315_v62 = vpop.f32.mrb[5].mxu0 }
 0xa68   : > { %v1677_v60 = vpop.permute.xlu1 %1676 }
 0xa69   : > { %v1685_v63 = vmul.f32 %v1677_v60, %v3605_v53 }
 0xa6b   : > { %v1687_v1 = vsel %vm809_vm6, %v1685_v63, 0.0 }
 0xa6c   : > { %v1688_v2 = vrot.slane %v1687_v1, 4  ;;  %v1684_v4 = vpop.permute.xlu1 %1683 }
 0xa6d   : > { %v1686_v6 = vmul.f32 %v1684_v4, %v3610_v55 }
 0xa6e   : > { %v1689_v7 = vadd.f32 %v1688_v2, %v1687_v1  ;;  %v1744_v1 = vrot.slane %v1736_v59, %v3648_v15 }
 0xa6f   : > { %v1694_v12 = vsel %vm809_vm6, %v1686_v6, 0.0 }
 0xa70   : > { %v1690_v13 = vrot.slane %v1689_v7, 2  ;;  %v1695_v14 = vrot.slane %v1694_v12, 4 }
 0xa72   : > { %v1691_v25 = vadd.f32 %v1690_v13, %v1689_v7  ;;  %v1696_v16 = vadd.f32 %v1695_v14, %v1694_v12 }
 0xa74   : > { %v1697_v18 = vrot.slane %v1696_v16, 2  ;;  %v1692_v11 = vrot.slane %v1691_v25, 1 }
 0xa76   : > { %v1698_v57 = vadd.f32 %v1697_v18, %v1696_v16  ;;  %v1693_v21 = vadd.f32 %v1692_v11, %v1691_v25 }
 0xa78   : > { %v1699_v19 = vrot.slane %v1698_v57, 1 }
 0xa7a   : > { %v1700_v22 = vadd.f32 %v1699_v19, %v1698_v57 }
 0xa7c   : > { %v3771_v23 = vsel %vm1311_vm2, %v1700_v22, %v1693_v21 }
 0xa7d   : > { %2321 = vmatmul.mubr.msk.f32.vlgmr.msra.gmra.mrb[6].mxu1 %vm809_vm6, %v3771_v23  ;;  %1899 = vst.msk [vmem:[#allocation2] sm:$0x3] %vm1259_vm9, %v3771_v23  ;;  %1916 = vst.msk [vmem:[#allocation23] sm:$0x3] (!%p2235_p12), %vm1259_vm9, %v3771_v23 }
 0xa90   : > { %v1647_v26 = vpop.permute.xlu0 %1646  ;;  %v1636_v29 = vpop.permute.xlu1 %1635 }
 0xa91   : > { %v1649_v27 = vmul.f32 %v1647_v26, %v1629_v24  ;;  %v1638_v32 = vmul.f32 %v1636_v29, %v1629_v24 }
 0xa93   : > { %1651 = vrot.lane.b32.xlu1 %v1649_v27, %s3122_s0 }
 0xa95   : > { %v1641_v30 = vpop.permute.xlu1 %1640 }
 0xa96   : > { %v1643_v31 = vmul.f32 %v1641_v30, %v1559_v36 }
 0xa97   : > { %1659 = vperm.xlu1 %2550, %v3740_v54  }
 0xa98   : > { %v1644_v47 = vadd.f32 %v1643_v31, %v1638_v32 }
 0xb05   : > { %v1652_v52 = vpop.permute.xlu1 %1651 }
 0xb06   : > { %v1654_v39 = vadd.f32 %v1652_v52, %v1644_v47 }
 0xb08   : > { %v1655_v33 = vadd.f32 1e-16, %v1654_v39 }
 0xb0a   : > { %2606 = vlog2.f32 %v1655_v33 }
 0xb14   : > { %v2607_v9 = vpop.eup %2606 }
 0xb15   : > { %v1657_v34 = vmul.f32 0.6931472, %v2607_v9 }
 0xb16   : > { %v1660_v35 = vpop.permute.xlu1 %1659 }
 0xb17   : > { %v1662_v0 = vmul.f32 %v1660_v35, %v1657_v34 }
 0xb19   : > { %v1663_v3 = vmul.f32 1.442695, %v1662_v0 }
 0xb1b   : > { %2608 = vpow2.f32 %v1663_v3 }
 0xb25   : > { %v2609_v10 = vpop.eup %2608 }
 0xb26   : > { %v1665_v48 = vsel %vm1315_vm3, %v2609_v10, 0.0 }
 0xb27   : > { %1666 = vadd.xlane.f32.xlu1 %v1665_v48 }
 0xb50   : > { %v1877_v54 = vpop.f32.mrb[6].mxu1 }
 0xb51   : > { %1882 = vrot.lane.b32.xlu0 %v1877_v54, %s3128_s18  ;;  %v2322_v36 = vpop.f32.mrb[7].mxu1 }
 0xbb4   : > { %v1667_v56 = vpop.xlane.xlu1 %1666 }
 0xbb5   : > { %v1668_v37 = vadd.f32 1e-16, %v1667_v56 }
 0xbb7   : > { %2610 = vrcp.f32 %v1668_v37 }
 0xbc1   : > { %v2611_v40 = vpop.eup %2610 }
 0xbc2   : > { %v3780_v41 = vmul.f32 %v2611_v40, %v2609_v10 }
 0xbc3   : > { %v1883_v49 = vpop.permute.xlu0 %1882 }
 0xbc4   : > { %v1704_v44 = vrot.slane %v3780_v41, %v3648_v15  ;;  %1901 = vst.msk [vmem:[#allocation4] sm:$0x3] %vm1315_vm3, %v3780_v41  ;;  %v1711_v45 = vrot.slane %v3780_v41, %v3667_v46  ;;  %v1885_v17 = vadd.f32 %v1883_v49, %v3635_v5  ;;  %v1768_v46 = vrot.slane %v3635_v5, %v3639_v8 }
 0xbc5   : > { %1918 = vst.msk [vmem:[#allocation26] sm:$0x3] (!%p2235_p12), %vm1315_vm3, %v3780_v41 }
 0xbc6   : > { %1706 = vbcast.lane.b32.xlu0 %v1704_v44, 256  ;;  %v2234_v50 = vmul.f32 -1.442695, %v1885_v17  ;;  %v1776_v38 = vrot.slane %v1768_v46, %v3639_v8  ;;  %v1769_v4 = vcombine.high %v1768_v46, %v1768_v46 }
 0xbc8   : > { %2612 = vpow2.f32 %v2234_v50  ;;  %v1787_v13 = vrot.slane %v1776_v38, %v3648_v15  ;;  %v1783_v14 = vrot.slane %v1769_v4, %v3639_v8 }
 0xbca   : > { %1713 = vbcast.lane.b32.xlu0 %v1711_v45, 256  ;;  %v1791_v25 = vrot.slane %v1783_v14, %v3648_v15 }
 0xbd2   : > { %v2613_v60 = vpop.eup %2612 }
 0xbd3   : > { %v1889_v7 = vadd.f32 1.0, %v2613_v60 }
 0xbd5   : > { %2614 = vrcp.f32 %v1889_v7 }
 0xbdf   : > { %v2615_v18 = vpop.eup %2614 }
 0xc38   : > { %v1707_v24 = vpop.permute.xlu0 %1706 }
 0xc39   : > { %v1747_v62 = vmul.f32 %v1740_v28, %v1707_v24  ;;  %v1794_v5 = vmul.f32 %v1787_v13, %v1707_v24 }
 0xc3b   : > { %v1749_v63 = vsub.f32 1.0, %v1747_v62 }
 0xc3c   : > { %v1714_v2 = vpop.permute.xlu0 %1713 }
 0xc3d   : > { %v1748_v6 = vmul.f32 %v1744_v1, %v1714_v2  ;;  %1753 = vrot.lane.b32.xlu1 %v1749_v63, %s3129_s17  ;;  %v1795_v16 = vmul.f32 %v1791_v25, %v1714_v2 }
 0xc3f   : > { %v1750_v12 = vsub.f32 1.0, %v1748_v6 }
 0xc41   : > { %1755 = vrot.lane.b32.xlu0 %v1750_v12, %s3129_s17 }
 0xc45   : > { %1798 = vrot.lane.b32.xlu0 %v1794_v5, %s3130_s1 }
 0xc49   : > { %1800 = vrot.lane.b32.xlu0 %v1795_v16, %s3130_s1 }
 0xc4d   : > { %1893 = vrot.lane.b32.xlu0 %v2615_v18, %s3131_s14 }
 0xc51   : > { %1906 = vrot.lane.b32.xlu0 %v3600_v43, %s3132_s16 }
 0xcaf   : > { %v1754_v11 = vpop.permute.xlu1 %1753 }
 0xcb0   : > { %v1759_v8 = vmul.f32 %v1754_v11, %v3605_v53 }
 0xcb3   : > { %v1756_v57 = vpop.permute.xlu0 %1755 }
 0xcb4   : > { %v1760_v22 = vmul.f32 %v1756_v57, %v3610_v55 }
 0xcb7   : > { %v1799_v19 = vpop.permute.xlu0 %1798 }
 0xcb8   : > { %v1804_v21 = vadd.f32 %v1799_v19, %v1759_v8 }
 0xcba   : > { %1910 = vst.msk [vmem:[#allocation7] sm:$0xff] %vm809_vm6, %v1804_v21  ;;  %1921 = vst.msk [vmem:[#allocation30] sm:$0xff] (!%p2235_p12), %vm809_vm6, %v1804_v21 }
 0xcbb   : > { %v1801_v15 = vpop.permute.xlu0 %1800 }
 0xcbc   : > { %v1805_v26 = vadd.f32 %v1801_v15, %v1760_v22 }
 0xcbe   : > { %1911 = vst.msk [vmem:[#allocation7 + $0x8] sm:$0xff] %vm809_vm6, %v1805_v26  ;;  %1915 = sbr.rel (%p2235_p12) target bundleno = 3269 (0xcc5), region = 124  ;;  %1922 = vst.msk [vmem:[#allocation30 + $0x8] sm:$0xff] (!%p2235_p12), %vm809_vm6, %v1805_v26 }
 0xcbf   : > { %v1894_v27 = vpop.permute.xlu0 %1893 }
 0xcc0   : > { %1897 = vst.msk [vmem:[%s3554_s3] sm:$0x3] %vm1896_vm4, %v1894_v27 }
 0xcc3   : > { %v1907_v29 = vpop.permute.xlu0 %1906 }
 0xcc4   : > { %1909 = vst.msk [vmem:[#allocation6] sm:$0x3] %vm1903_vm8, %v1907_v29  ;;  %1920 = vst.msk [vmem:[#allocation29] sm:$0x3] (!%p2235_p12), %vm1903_vm8, %v1907_v29 }
 0xcc5 PF: > { %p2445_p8 = scmp.eq.s32.totalorder %s3272_s29, 5  ;;  %s3133_s3 = smov [#allocation24]  }
 0xcc6   : > { %s1948_s2 = sshll.u32 %s3133_s3, 4  ;;  %s3134_s4 = smov [#allocation27]   ;;  %s1949_s2 = int_to_ptr.vmem [resolvable:$true] %s1948_s2 }
 0xcc7   : > { %s1970_s23 = sshll.u32 %s3134_s4, 4  ;;  %s2870_s0 = scalar_lea.vmem %s1949_s2, 32  ;;  %s1971_s23 = int_to_ptr.vmem [resolvable:$true] %s1970_s23 }
 0xcc8   : > { %p2871_p13 = scmp.ne.s32.totalorder %s1949_s2, %s2870_s0  ;;  %p2877_p6 = scmp.lt.s32.totalorder %s1949_s2, %s1949_s2 }
 0xcc9   : > { %p2878_p0 = scmp.lt.s32.totalorder %s2870_s0, %s2870_s0 }
 0xcca   : > { %p2872_p11 = pnand %p2871_p13, %p2445_p8 }
 0xccb   : > { %p2879_p1 = por %p2878_p0, %p2877_p6 }
 0xccc   : > { %p2873_p10 = pneg %p2872_p11 }
 0xcce   : > { %p2880_p4 = pnand %p2879_p1, %p2873_p10 }
 0xcd0   : > { %2883 = shalt.err (!%p2880_p4)
}
 0xcd1   : > { %s4039_s24 = sld [smem:[#allocation53_spill]] }
 0xcd7   : > { %s2884_s5 = scalar_lea.hbm %s4039_s24, 32 }
 0xcd8   : > { %p2885_p2 = scmp.ne.s32.totalorder %s4039_s24, %s2884_s5  ;;  %p2890_p9 = scmp.lt.u32.totalorder %s2884_s5, %s4039_s24 }
 0xcda   : > { %p2886_p7 = pnand %p2885_p2, %p2445_p8 }
 0xcdc   : > { %p2887_p5 = pneg %p2886_p7 }
 0xcde   : > { %p2892_p3 = pnand %p2890_p9, %p2887_p5 }
 0xce0   : > { %2895 = shalt.err (!%p2892_p3)
}
 0xce1   : > { %2378 = dma.vmem_to_hbm [thread:$0]  (%p2445_p8), %s1949_s2, 32, %s4039_s24, [#allocation25]  }
 0xce2   : > { %s2896_s3 = scalar_lea.vmem %s1971_s23, 32  ;;  %p2903_p10 = scmp.lt.s32.totalorder %s1971_s23, %s1971_s23 }
 0xce3   : > { %p2897_p12 = scmp.ne.s32.totalorder %s1971_s23, %s2896_s3  ;;  %p2904_p6 = scmp.lt.s32.totalorder %s2896_s3, %s2896_s3 }
 0xce5   : > { %p2898_p13 = pnand %p2897_p12, %p2445_p8  ;;  %p2905_p0 = por %p2904_p6, %p2903_p10 }
 0xce7   : > { %p2899_p11 = pneg %p2898_p13 }
 0xce9   : > { %p2906_p1 = pnand %p2905_p0, %p2899_p11 }
 0xceb   : > { %2909 = shalt.err (!%p2906_p1)
}
 0xcec   : > { %s4040_s19 = sld [smem:[#allocation55_spill]] }
 0xcf2   : > { %s2910_s28 = scalar_lea.hbm %s4040_s19, 32 }
 0xcf3   : > { %p2911_p4 = scmp.ne.s32.totalorder %s4040_s19, %s2910_s28  ;;  %p2916_p5 = scmp.lt.u32.totalorder %s2910_s28, %s4040_s19 }
 0xcf5   : > { %p2912_p2 = pnand %p2911_p4, %p2445_p8 }
 0xcf7   : > { %p2913_p7 = pneg %p2912_p2 }
 0xcf9   : > { %p2918_p9 = pnand %p2916_p5, %p2913_p7 }
 0xcfb   : > { %2921 = shalt.err (!%p2918_p9)
}
 0xcfc   : > { %2382 = dma.vmem_to_hbm [thread:$0]  (%p2445_p8), %s1971_s23, 32, %s4040_s19, [#allocation28]  }
 0xcfd   : > { %s3135_s14 = smov [#allocation23]   ;;  %s3136_s3 = smov [#allocation26]  }
 0xcfe   : > { %s1937_s16 = sshll.u32 %s3135_s14, 4  ;;  %s1959_s4 = sshll.u32 %s3136_s3, 4  ;;  %s1938_s16 = int_to_ptr.vmem [resolvable:$true] %s1937_s16  ;;  %s1960_s4 = int_to_ptr.vmem [resolvable:$true] %s1959_s4 }
 0xcff   : > { %s2922_s0 = scalar_lea.vmem %s1938_s16, 32  ;;  %p2929_p11 = scmp.lt.s32.totalorder %s1938_s16, %s1938_s16 }
 0xd00   : > { %p2923_p3 = scmp.ne.s32.totalorder %s1938_s16, %s2922_s0  ;;  %p2930_p10 = scmp.lt.s32.totalorder %s2922_s0, %s2922_s0 }
 0xd02   : > { %p2924_p12 = pnand %p2923_p3, %p2445_p8  ;;  %p2931_p6 = por %p2930_p10, %p2929_p11 }
 0xd04   : > { %p2925_p13 = pneg %p2924_p12 }
 0xd06   : > { %p2932_p0 = pnand %p2931_p6, %p2925_p13 }
 0xd08   : > { %2935 = shalt.err (!%p2932_p0)
}
 0xd09   : > { %s4041_s27 = sld [smem:[#allocation52_spill]] }
 0xd0f   : > { %s4042_s18 = smov %s4041_s27  ;;  %s2936_s23 = scalar_lea.hbm %s4041_s27, 32 }
 0xd10   : > { %p2937_p1 = scmp.ne.s32.totalorder %s4042_s18, %s2936_s23  ;;  %p2942_p7 = scmp.lt.u32.totalorder %s2936_s23, %s4042_s18 }
 0xd12   : > { %p2938_p4 = pnand %p2937_p1, %p2445_p8 }
 0xd14   : > { %p2939_p2 = pneg %p2938_p4 }
 0xd16   : > { %p2944_p5 = pnand %p2942_p7, %p2939_p2 }
 0xd18   : > { %2947 = shalt.err (!%p2944_p5)
}
 0xd19   : > { %2376 = dma.vmem_to_hbm [thread:$0]  (%p2445_p8), %s1938_s16, 32, %s4042_s18, [#allocation10]  }
 0xd1a   : > { %s2948_s28 = scalar_lea.vmem %s1960_s4, 32  ;;  %p2955_p13 = scmp.lt.s32.totalorder %s1960_s4, %s1960_s4 }
 0xd1b   : > { %p2949_p9 = scmp.ne.s32.totalorder %s1960_s4, %s2948_s28  ;;  %p2956_p11 = scmp.lt.s32.totalorder %s2948_s28, %s2948_s28 }
 0xd1d   : > { %p2950_p3 = pnand %p2949_p9, %p2445_p8  ;;  %p2957_p10 = por %p2956_p11, %p2955_p13 }
 0xd1f   : > { %p2951_p12 = pneg %p2950_p3 }
 0xd21   : > { %p2958_p6 = pnand %p2957_p10, %p2951_p12 }
 0xd23   : > { %2961 = shalt.err (!%p2958_p6)
}
 0xd24   : > { %s4043_s23 = sld [smem:[#allocation54_spill]] }
 0xd2a   : > { %s2962_s2 = scalar_lea.hbm %s4043_s23, 32 }
 0xd2b   : > { %p2963_p0 = scmp.ne.s32.totalorder %s4043_s23, %s2962_s2  ;;  %p2968_p2 = scmp.lt.u32.totalorder %s2962_s2, %s4043_s23 }
 0xd2d   : > { %p2964_p1 = pnand %p2963_p0, %p2445_p8 }
 0xd2f   : > { %p2965_p4 = pneg %p2964_p1 }
 0xd31   : > { %p2970_p7 = pnand %p2968_p2, %p2965_p4 }
 0xd33   : > { %2973 = shalt.err (!%p2970_p7)
}
 0xd34   : > { %2380 = dma.vmem_to_hbm [thread:$0]  (%p2445_p8), %s1960_s4, 32, %s4043_s23, [#allocation25]  }
 0xd35   : > { %s3137_s28 = smov [#allocation29]   ;;  %s3138_s27 = smov [#allocation30]  }
 0xd36   : > { %s1981_s5 = sshll.u32 %s3137_s28, 4  ;;  %s1991_s17 = sshll.u32 %s3138_s27, 4  ;;  %s1982_s5 = int_to_ptr.vmem [resolvable:$true] %s1981_s5  ;;  %s1992_s17 = int_to_ptr.vmem [resolvable:$true] %s1991_s17 }
 0xd37   : > { %s2974_s1 = scalar_lea.vmem %s1982_s5, 32  ;;  %p2981_p12 = scmp.lt.s32.totalorder %s1982_s5, %s1982_s5 }
 0xd38   : > { %p2975_p5 = scmp.ne.s32.totalorder %s1982_s5, %s2974_s1  ;;  %p2982_p13 = scmp.lt.s32.totalorder %s2974_s1, %s2974_s1 }
 0xd3a   : > { %p2976_p9 = pnand %p2975_p5, %p2445_p8  ;;  %p2983_p11 = por %p2982_p13, %p2981_p12 }
 0xd3c   : > { %p2977_p3 = pneg %p2976_p9 }
 0xd3e   : > { %p2984_p10 = pnand %p2983_p11, %p2977_p3 }
 0xd40   : > { %2987 = shalt.err (!%p2984_p10)
}
 0xd41   : > { %s4044_s14 = sld [smem:[#allocation56_spill]] }
 0xd47   : > { %s2988_s4 = scalar_lea.hbm %s4044_s14, 32 }
 0xd48   : > { %p2989_p6 = scmp.ne.s32.totalorder %s4044_s14, %s2988_s4  ;;  %p2994_p4 = scmp.lt.u32.totalorder %s2988_s4, %s4044_s14 }
 0xd4a   : > { %p2990_p0 = pnand %p2989_p6, %p2445_p8 }
 0xd4c   : > { %p2991_p1 = pneg %p2990_p0 }
 0xd4e   : > { %p2996_p2 = pnand %p2994_p4, %p2991_p1 }
 0xd50   : > { %2999 = shalt.err (!%p2996_p2)
}
 0xd51   : > { %2384 = dma.vmem_to_hbm [thread:$0]  (%p2445_p8), %s1982_s5, 32, %s4044_s14, [#allocation28]  }
 0xd52   : > { %s3000_s2 = scalar_lea.vmem %s1992_s17, 256  ;;  %p3007_p3 = scmp.lt.s32.totalorder %s1992_s17, %s1992_s17 }
 0xd53   : > { %p3001_p7 = scmp.ne.s32.totalorder %s1992_s17, %s3000_s2  ;;  %p3008_p12 = scmp.lt.s32.totalorder %s3000_s2, %s3000_s2 }
 0xd55   : > { %p3002_p5 = pnand %p3001_p7, %p2445_p8  ;;  %p3009_p13 = por %p3008_p12, %p3007_p3 }
 0xd57   : > { %p3003_p9 = pneg %p3002_p5 }
 0xd59   : > { %p3010_p11 = pnand %p3009_p13, %p3003_p9 }
 0xd5b   : > { %3013 = shalt.err (!%p3010_p11)
}
 0xd5c   : > { %s4045_s3 = sld [smem:[#allocation57_spill]] }
 0xd62   : > { %s3014_s0 = scalar_lea.hbm %s4045_s3, 256 }
 0xd63   : > { %p3015_p10 = scmp.ne.s32.totalorder %s4045_s3, %s3014_s0  ;;  %p3020_p1 = scmp.lt.u32.totalorder %s3014_s0, %s4045_s3 }
 0xd65   : > { %p3016_p6 = pnand %p3015_p10, %p2445_p8 }
 0xd67   : > { %p3017_p0 = pneg %p3016_p6 }
 0xd69   : > { %p3022_p4 = pnand %p3020_p1, %p3017_p0 }
 0xd6b   : > { %3025 = shalt.err (!%p3022_p4)
}
 0xd6c   : > { %s3139_s1 = smov 128   ;;  %s3140_s2 = smov 8  }
 0xd6d   : > { %2386 = dma.vmem_to_hbm [thread:$0]  (%p2445_p8), %s1992_s17, 256, %s4045_s3, [#allocation31], %s3139_s1, %s3139_s1, %s3140_s2  }
 0xd6e   : > { %3063 = dma.done.wait (%p2445_p8), [#allocation10], 32  }
 0xd6f   : > { %3065 = vsyncadd (%p2445_p8), [#allocation10], 4294967264 }
 0xd70   : > { %3067 = dma.done.wait (%p2445_p8), [#allocation25], 64  }
 0xd71   : > { %3069 = vsyncadd (%p2445_p8), [#allocation25], 4294967232 }
 0xd72   : > { %3071 = dma.done.wait (%p2445_p8), [#allocation28], 64  }
 0xd73   : > { %3073 = vsyncadd (%p2445_p8), [#allocation28], 4294967232 }
 0xd74   : > { %3075 = dma.done.wait (%p2445_p8), [#allocation31], 256  }
 0xd75   : > { %3077 = vsyncadd (%p2445_p8), [#allocation31], 4294967040 }
 0xd76 PF: > { %p40_p2 = scmp.ge.s32.totalorder %s3465_s10, 8   ;;  %s4046_s2 = smov %s3084_s25 }
 0xd77   : > { %s4047_s25 = smov %s3088_s26  ;;  %s4048_s26 = smov %s3477_s7 }
 0xd78   : > { %s4049_s27 = smov %s3465_s10  ;;  %42 = sbr.rel (!%p40_p2) target bundleno = 29 (0x1d), region = 209 }
 0xd7f   :  { %2034 = vsyncpa [#allocation9], 1 }
 0xd80   :  { %2036 = vsyncpa [#allocation9 + $0x1], 1 }
 0xd81   :  { %2037 = vsyncpa [#allocation12], 1 }
 0xd82   :  { %2038 = vsyncpa [#allocation15], 1 }
 0xd83   :  { %2039 = vsyncpa [#allocation18], 1 }
 0xd84   :  { %2040 = vsyncpa [#allocation21], 1 }
 0xd85   :  { %2041 = vsyncpa [#allocation10], 1 }
 0xd86   :  { %2043 = vsyncpa [#allocation10 + $0x1], 1 }
 0xd87   :  { %2044 = vsyncpa [#allocation25], 1 }
 0xd88   :  { %2045 = vsyncpa [#allocation28], 1 }
 0xd89   :  { %2046 = vsyncpa [#allocation31], 1 }

</bundles_post_ra>
